<compile_context>
chip_gen: v5e
topology: v5e:2x2
jax: 0.10.0
libtpu: 0.0.40
codegen_flags: <defaults>
</compile_context>

<pallas_src>
import functools

import jax
import jax.numpy as jnp
from jax import lax
from jax.experimental import pallas as pl
from jax.experimental.pallas import tpu as pltpu

MM_DTYPE = jnp.bfloat16   # MXU input dtype; accumulation stays f32.
BN_EPS = 1e-5
W_COLS = 64               # packed-slab width: >= max Cout (64) and >= 2*latent (20)


# ----------------------------------- fused forward kernel ----------------------------------------

def _build_fused_kernel(B, L0, spec):
    """spec = (K, latent, c_last, Lf, layers_spec, wh_off, bh_row); layers_spec is a tuple of
    (blocks_spec, bn_scale_row, bn_shift_row); each block is
    (dilation, cin, cout, w1_off, b1_row, w2_off, b2_row, wd_off, bd_row)."""
    (K, latent, c_last, Lf, layers_spec, wh_off, bh_row) = spec
    assert L0 > 0 and (L0 & (L0 - 1)) == 0, "time length must be a power of two"

    mask_cache = {}   # memoize the (BL,1) time-boundary masks (trace-time reuse)

    def time_mask(BL, L, s):
        key = (BL, L, s)
        if key not in mask_cache:
            r = lax.broadcasted_iota(jnp.int32, (BL, 1), 0)          # row index b*L + t
            mask_cache[key] = jnp.bitwise_and(r, L - 1) >= s          # t >= s (L is a power of 2)
        return mask_cache[key]

    def kernel(x_ref, w_ref, b_ref, out_ref, xcat_ref, pool_ref, flat_ref):

        def bias(row, c):                       # (1, c) f32 row view from the bias/BN slab
            return b_ref[row:row + 1, 0:c]

        def conv(x, BL, L, cin, cout, dil, w_off, b_row):
            """Causal dilated conv + bias + ReLU  (== Conv1d + Chomp1d + ReLU, Dropout=identity).

            Each of the K taps is a causal shift of x: pltpu.roll on sublanes (XLU) masked at the
            per-batch time boundary (VPU).  Taps are staged side-by-side into xcat_ref so the
            whole conv is ONE (BL, K*cin) x (K*cin, cout) MXU matmul (weight rows = k*cin + ci).
            """
            for k in range(K):
                s = (K - 1 - k) * dil
                if s == 0:
                    tap = x
                elif s >= L:                                   # tap sees only the implicit zero pad
                    tap = jnp.zeros_like(x)
                else:
                    tap = jnp.where(time_mask(BL, L, s),
                                    pltpu.roll(x, shift=s, axis=0),
                                    jnp.zeros_like(x))
                xcat_ref[0:BL, k * cin:(k + 1) * cin] = tap
            xcat = xcat_ref[0:BL, 0:K * cin].astype(MM_DTYPE)          # single bf16 cast per conv
            w = w_ref[w_off:w_off + K * cin, 0:cout]                   # (K*cin, cout) bf16 view
            acc = jnp.dot(xcat, w, preferred_element_type=jnp.float32)
            return jnp.maximum(acc + bias(b_row, cout), 0.0)

        h = x_ref[...].astype(jnp.float32)          # (B*L0, Cin0), stays in VMEM/vregs throughout
        L, BL = L0, B * L0
        for (blocks_spec, bn_s_row, bn_t_row) in layers_spec:
            for (dil, cin, cout, w1_off, b1_row, w2_off, b2_row, wd_off, bd_row) in blocks_spec:
                out = conv(h, BL, L, cin, cout, dil, w1_off, b1_row)       # conv1+chomp+relu
                out = conv(out, BL, L, cout, cout, dil, w2_off, b2_row)    # conv2+chomp+relu
                if wd_off >= 0:                                            # 1x1 downsample conv
                    wd = w_ref[wd_off:wd_off + cin, 0:cout]
                    res = jnp.dot(h.astype(MM_DTYPE), wd,
                                  preferred_element_type=jnp.float32) + bias(bd_row, cout)
                else:
                    res = h
                h = jnp.maximum(out + res, 0.0)                            # residual add + relu
            # BatchNorm1d (eval, pre-folded scale/shift) fused with MaxPool1d(2): write the
            # normalized rows once, then pairwise-max of even/odd rows via stride-2 sublane
            # loads -- no selection matrices, no MXU work.
            y = h * bias(bn_s_row, c_last) + bias(bn_t_row, c_last)
            pool_ref[0:BL, :] = y
            BL //= 2
            L //= 2
            h = jnp.maximum(pool_ref[pl.ds(0, BL, stride=2), :],
                            pool_ref[pl.ds(1, BL, stride=2), :])
        # torch.flatten(x, 1) on NCL uses flat index c*Lf + l; whead was re-ordered host-side to
        # rows l*c_last + c, so staging h time-major into (B, Lf*c_last) lets both linear heads
        # (mu | log_var concatenated on the output axis) be ONE matmul.
        pool_ref[0:BL, :] = h                                   # BL == B*Lf here
        for l in range(Lf):
            flat_ref[:, l * c_last:(l + 1) * c_last] = pool_ref[pl.ds(l, B, stride=Lf), :]
        wh = w_ref[wh_off:wh_off + Lf * c_last, 0:2 * latent]
        head = jnp.dot(flat_ref[...].astype(MM_DTYPE), wh,
                       preferred_element_type=jnp.float32)
        # NOTE: (B, 2*latent)=(2, 20) -> masked final store; negligible at this size (pad the
        # packed head out-dim to a multiple of 128 if latent/B ever grow).
        out_ref[...] = (head + bias(bh_row, 2 * latent)).astype(out_ref.dtype)

    return kernel


@functools.partial(jax.jit, static_argnames=("spec",))
def _forward_impl(x_ncl, w_slab, b_slab, spec):
    (K, latent, c_last, Lf, layers_spec, wh_off, bh_row) = spec
    B, C, L0 = x_ncl.shape
    # Only per-call glue: NCL -> (B*L, C) so channels sit on lanes and batch folds into MXU M.
    # TODO(synk): absorb this relayout into the kernel (BlockSpec index_map) at production sizes.
    x2 = jnp.transpose(x_ncl, (0, 2, 1)).reshape(B * L0, C).astype(jnp.float32)
    max_c = 1
    for blocks_spec, _, _ in layers_spec:
        for blk in blocks_spec:
            max_c = max(max_c, blk[1], blk[2])
    kernel = _build_fused_kernel(B, L0, spec)
    vmem = pl.BlockSpec(memory_space=pltpu.MemorySpace.VMEM)
    out = pl.pallas_call(
        kernel,
        out_shape=jax.ShapeDtypeStruct((B, 2 * latent), jnp.float32),
        in_specs=[vmem, vmem, vmem],            # 3 operands -> 3 HBM->VMEM DMAs total
        out_specs=vmem,
        scratch_shapes=[
            pltpu.VMEM((B * L0, K * max_c), jnp.float32),   # staged conv taps (xcat)
            pltpu.VMEM((B * L0, c_last), jnp.float32),      # BN+maxpool / flatten staging
            pltpu.VMEM((B, Lf * c_last), jnp.float32),      # flattened (B, Lf*C) features
        ],
        # No grid: whole (tiny) forward is one invocation; all activations stay on-chip.
    )(x2, w_slab, b_slab)
    return out[:, :latent], out[:, latent:]


def tcn_encoder_forward(x_ncl, prepared):
    """x_ncl: (B, C, L) NCL input (as in PyTorch).  Returns (mu, log_var)."""
    w_slab, b_slab, spec = prepared
    return _forward_impl(x_ncl, w_slab, b_slab, spec)


# -------------------------------- parameters (synthetic, torch-like) -----------------------------

def init_params(key, in_channels, num_tcn_layers=2, tcn_channels=(64, 32, 16), K=3, latent_dim=10):
    """Synthetic weights matching the PyTorch module (conv weight stored as (K, Cin, Cout) ==
    torch weight[co, ci, k] transposed; BN uses fresh running stats; heads act on the
    channel-major flatten index c*L_final + l)."""
    params = {"layers": []}
    c_in = in_channels
    for layer in range(num_tcn_layers):
        if layer != 0:
            c_in = tcn_channels[-1]
        blocks, ci = [], c_in
        for i, co in enumerate(tcn_channels):
            dilation = 2 ** i
            key, k1, k2, k3, k4, k5, k6 = jax.random.split(key, 7)
            blk = {
                "dilation": dilation,
                "w1": 0.01 * jax.random.normal(k1, (K, ci, co), jnp.float32),
                "b1": 0.01 * jax.random.normal(k2, (co,), jnp.float32),
                "w2": 0.01 * jax.random.normal(k3, (K, co, co), jnp.float32),
                "b2": 0.01 * jax.random.normal(k4, (co,), jnp.float32),
            }
            if ci != co:
                blk["wd"] = 0.01 * jax.random.normal(k5, (1, ci, co), jnp.float32)
                blk["bd"] = 0.01 * jax.random.normal(k6, (co,), jnp.float32)
            blocks.append(blk)
            ci = co
        c_last = tcn_channels[-1]
        params["layers"].append({
            "blocks": blocks,
            "bn": {"gamma": jnp.ones((c_last,), jnp.float32),
                   "beta": jnp.zeros((c_last,), jnp.float32),
                   "mean": jnp.zeros((c_last,), jnp.float32),
                   "var": jnp.ones((c_last,), jnp.float32)},
        })
    key, k1, k2, k3, k4 = jax.random.split(key, 5)
    flat_dim = 16 * 4   # hard-coded in the PyTorch module (C_last=16, L_final=4)
    params["w_mu"] = 0.1 * jax.random.normal(k1, (flat_dim, latent_dim), jnp.float32)
    params["b_mu"] = 0.1 * jax.random.normal(k2, (latent_dim,), jnp.float32)
    params["w_lv"] = 0.1 * jax.random.normal(k3, (flat_dim, latent_dim), jnp.float32)
    params["b_lv"] = 0.1 * jax.random.normal(k4, (latent_dim,), jnp.float32)
    return params


def prepare_params(params, L0):
    """One-time host-side packing (off the per-call path):
       * every conv weight reshaped to (K*Cin, Cout) rows (row = k*Cin + ci) so each causal conv
         is a single matmul over the folded contraction K*Cin,
       * ALL bf16 matmul weights packed into ONE bf16 slab (segment row offsets padded to 16 =
         the bf16 sublane tile) -> one weight DMA,
       * ALL f32 biases + pre-folded BatchNorm scale/shift + head bias packed into ONE f32 slab,
       * both linear heads concatenated and re-ordered to the kernel's l*C+c flatten order.
    Returns (w_slab bf16, b_slab f32, static spec tuple)."""
    w_segs, b_rows = [], []
    w_off = 0

    def add_w(mat):
        nonlocal w_off
        r, c = mat.shape
        assert c <= W_COLS
        r_pad = -(-r // 16) * 16
        w_segs.append(jnp.zeros((r_pad, W_COLS), jnp.float32).at[:r, :c].set(mat))
        off = w_off
        w_off += r_pad
        return off

    def add_b(vec):
        assert vec.shape[0] <= W_COLS
        b_rows.append(jnp.zeros((W_COLS,), jnp.float32).at[:vec.shape[0]].set(vec))
        return len(b_rows) - 1

    K = params["layers"][0]["blocks"][0]["w1"].shape[0]
    c_last = params["layers"][-1]["blocks"][-1]["w2"].shape[2]
    layers_spec = []
    L = L0
    for layer in params["layers"]:
        blocks_spec = []
        for blk in layer["blocks"]:
            Kk, cin, cout = blk["w1"].shape
            assert Kk == K
            w1_off = add_w(blk["w1"].reshape(K * cin, cout))
            b1_row = add_b(blk["b1"])
            w2_off = add_w(blk["w2"].reshape(K * cout, cout))
            b2_row = add_b(blk["b2"])
            if "wd" in blk:
                wd_off = add_w(blk["wd"].reshape(cin, cout))
                bd_row = add_b(blk["bd"])
            else:
                wd_off, bd_row = -1, -1
            blocks_spec.append((int(blk["dilation"]), int(cin), int(cout),
                                int(w1_off), int(b1_row), int(w2_off), int(b2_row),
                                int(wd_off), int(bd_row)))
        assert blocks_spec[-1][2] == c_last
        bn = layer["bn"]
        scale = bn["gamma"] * lax.rsqrt(bn["var"] + BN_EPS)
        shift = bn["beta"] - bn["mean"] * scale
        s_row = add_b(scale)
        t_row = add_b(shift)
        layers_spec.append((tuple(blocks_spec), int(s_row), int(t_row)))
        L //= 2                       # MaxPool1d(2); L stays a power of two here
    latent = params["w_mu"].shape[1]
    assert 2 * latent <= W_COLS
    Lf = L
    w_cat = jnp.concatenate([params["w_mu"], params["w_lv"]], axis=1)      # rows = c*Lf + l
    assert w_cat.shape[0] == c_last * Lf, "head flat_dim must equal C_last * L_final"
    whead = jnp.transpose(w_cat.reshape(c_last, Lf, 2 * latent),
                          (1, 0, 2)).reshape(Lf * c_last, 2 * latent)      # rows = l*C + c
    wh_off = add_w(whead)
    bh_row = add_b(jnp.concatenate([params["b_mu"], params["b_lv"]]))

    w_slab = jnp.concatenate(w_segs, axis=0).astype(MM_DTYPE)
    pad = (-len(b_rows)) % 8
    b_slab = jnp.stack(b_rows + [jnp.zeros((W_COLS,), jnp.float32)] * pad, axis=0)
    spec = (int(K), int(latent), int(c_last), int(Lf),
            tuple(layers_spec), int(wh_off), int(bh_row))
    return w_slab, b_slab, spec


# ------------------------------- plain-JAX reference (for checking) ------------------------------

def reference_forward(x_ncl, params):
    h = jnp.transpose(x_ncl, (0, 2, 1)).astype(jnp.float32)               # (B, L, C)

    def causal_conv(h, w, b, d, relu):
        K, L = w.shape[0], h.shape[1]
        pad = (K - 1) * d
        hp = jnp.pad(h, ((0, 0), (pad, 0), (0, 0)))
        out = jnp.zeros(h.shape[:2] + (w.shape[2],), jnp.float32)
        for k in range(K):
            out = out + jnp.einsum("blc,cd->bld", hp[:, k * d:k * d + L, :], w[k])
        out = out + b.reshape(1, 1, -1)
        return jnp.maximum(out, 0.0) if relu else out

    for layer in params["layers"]:
        for blk in layer["blocks"]:
            out = causal_conv(h, blk["w1"], blk["b1"], blk["dilation"], True)
            out = causal_conv(out, blk["w2"], blk["b2"], blk["dilation"], True)
            res = causal_conv(h, blk["wd"], blk["bd"], 1, False) if "wd" in blk else h
            h = jnp.maximum(out + res, 0.0)
        bn = layer["bn"]
        scale = bn["gamma"] * lax.rsqrt(bn["var"] + BN_EPS)
        shift = bn["beta"] - bn["mean"] * scale
        y = h * scale.reshape(1, 1, -1) + shift.reshape(1, 1, -1)
        B, L, C = y.shape
        h = jnp.max(y.reshape(B, L // 2, 2, C), axis=2)
    B = h.shape[0]
    flat = jnp.transpose(h, (0, 2, 1)).reshape(B, -1)
    mu = flat @ params["w_mu"] + params["b_mu"]
    log_var = flat @ params["w_lv"] + params["b_lv"]
    return mu, log_var


if __name__ == "__main__":
    # TCNEncoder(input_shape=(4, 16), num_tcn_layers=2, tcn_num_channels=[64, 32, 16],
    #            kernel_size=3, latent_dim=10); input x: (B=2, C=4, L=16) NCL.
    key = jax.random.PRNGKey(0)
    kx, kp = jax.random.split(key)
    B, C, L = 2, 4, 16
    x = jax.random.normal(kx, (B, C, L), jnp.float32)
    params = init_params(kp, in_channels=C, num_tcn_layers=2,
                         tcn_channels=(64, 32, 16), K=3, latent_dim=10)

    prepared = prepare_params(params, L0=L)
    mu, log_var = tcn_encoder_forward(x, prepared)
    jax.block_until_ready((mu, log_var))

    assert mu.shape == (B, 10) and log_var.shape == (B, 10)
    assert bool(jnp.all(jnp.isfinite(mu))) and bool(jnp.all(jnp.isfinite(log_var)))

    # Validate against a plain-JAX f32 reference (tolerance covers the bf16 MXU inputs).
    mu_ref, lv_ref = reference_forward(x, params)
    assert jnp.allclose(mu, mu_ref, rtol=5e-2, atol=5e-3), \
        float(jnp.max(jnp.abs(mu - mu_ref)))
    assert jnp.allclose(log_var, lv_ref, rtol=5e-2, atol=5e-3), \
        float(jnp.max(jnp.abs(log_var - lv_ref)))
    print("KERNEL_OK")
</pallas_src>

<mosaic_0001>
module attributes {stable_mosaic.version = 11 : i64} {
  func.func @kernel(%arg0: memref<32x4xf32, #tpu.memory_space<vmem>>, %arg1: memref<1600x64xbf16, #tpu.memory_space<vmem>>, %arg2: memref<24x64xf32, #tpu.memory_space<vmem>>, %arg3: memref<2x20xf32, #tpu.memory_space<vmem>>, %arg4: memref<32x192xf32, #tpu.memory_space<vmem>>, %arg5: memref<32x16xf32, #tpu.memory_space<vmem>>, %arg6: memref<2x64xf32, #tpu.memory_space<vmem>>) attributes {dimension_semantics = [], scalar_prefetch = 0 : i64, scratch_operands = 3 : i64, tpu.core_type = #tpu.core_type<tc>} {
    %c0 = arith.constant 0 : index
    %c0_0 = arith.constant 0 : index
    %0 = vector.load %arg0[%c0, %c0_0] : memref<32x4xf32, #tpu.memory_space<vmem>>, vector<32x4xf32>
    %1 = tpu.iota {dimensions = array<i32: 0>} : vector<32x1xi32>
    %c15_i32 = arith.constant 15 : i32
    %2 = vector.broadcast %c15_i32 : i32 to vector<32x1xi32>
    %3 = arith.andi %1, %2 : vector<32x1xi32>
    %c2_i32 = arith.constant 2 : i32
    %4 = vector.broadcast %c2_i32 : i32 to vector<32x1xi32>
    %5 = arith.cmpi sge, %3, %4 : vector<32x1xi32>
    %c2_i32_1 = arith.constant 2 : i32
    %6 = tpu.dynamic_rotate %0 by %c2_i32_1 dim 0 : vector<32x4xf32>, i32 -> vector<32x4xf32>
    %cst = arith.constant 0.000000e+00 : f32
    %7 = vector.broadcast %cst : f32 to vector<32x4xf32>
    %8 = vector.shape_cast %5 : vector<32x1xi1> to vector<32x1xi1>
    %9 = vector.broadcast %8 : vector<32x1xi1> to vector<32x4xi1>
    %10 = arith.select %9, %6, %7 : vector<32x4xi1>, vector<32x4xf32>
    %c0_2 = arith.constant 0 : index
    %c0_3 = arith.constant 0 : index
    %11 = vector.load %arg4[%c0_2, %c0_3] : memref<32x192xf32, #tpu.memory_space<vmem>>, vector<32x4xf32>
    tpu.vector_store %arg4[%c0_2, %c0_3], %10 {strides = array<i32>} : memref<32x192xf32, #tpu.memory_space<vmem>>, vector<32x4xf32>,
    %12 = tpu.iota {dimensions = array<i32: 0>} : vector<32x1xi32>
    %c15_i32_4 = arith.constant 15 : i32
    %13 = vector.broadcast %c15_i32_4 : i32 to vector<32x1xi32>
    %14 = arith.andi %12, %13 : vector<32x1xi32>
    %c1_i32 = arith.constant 1 : i32
    %15 = vector.broadcast %c1_i32 : i32 to vector<32x1xi32>
    %16 = arith.cmpi sge, %14, %15 : vector<32x1xi32>
    %c1_i32_5 = arith.constant 1 : i32
    %17 = tpu.dynamic_rotate %0 by %c1_i32_5 dim 0 : vector<32x4xf32>, i32 -> vector<32x4xf32>
    %cst_6 = arith.constant 0.000000e+00 : f32
    %18 = vector.broadcast %cst_6 : f32 to vector<32x4xf32>
    %19 = vector.shape_cast %16 : vector<32x1xi1> to vector<32x1xi1>
    %20 = vector.broadcast %19 : vector<32x1xi1> to vector<32x4xi1>
    %21 = arith.select %20, %17, %18 : vector<32x4xi1>, vector<32x4xf32>
    %c0_7 = arith.constant 0 : index
    %c4 = arith.constant 4 : index
    %22 = vector.load %arg4[%c0_7, %c4] : memref<32x192xf32, #tpu.memory_space<vmem>>, vector<32x4xf32>
    tpu.vector_store %arg4[%c0_7, %c4], %21 {strides = array<i32>} : memref<32x192xf32, #tpu.memory_space<vmem>>, vector<32x4xf32>,
    %c0_8 = arith.constant 0 : index
    %c8 = arith.constant 8 : index
    %23 = vector.load %arg4[%c0_8, %c8] : memref<32x192xf32, #tpu.memory_space<vmem>>, vector<32x4xf32>
    tpu.vector_store %arg4[%c0_8, %c8], %0 {strides = array<i32>} : memref<32x192xf32, #tpu.memory_space<vmem>>, vector<32x4xf32>,
    %c0_9 = arith.constant 0 : index
    %c0_10 = arith.constant 0 : index
    %24 = vector.load %arg4[%c0_9, %c0_10] : memref<32x192xf32, #tpu.memory_space<vmem>>, vector<32x12xf32>
    %25 = arith.truncf %24 : vector<32x12xf32> to vector<32x12xbf16>
    %c0_11 = arith.constant 0 : index
    %c0_12 = arith.constant 0 : index
    %26 = vector.load %arg1[%c0_11, %c0_12] : memref<1600x64xbf16, #tpu.memory_space<vmem>>, vector<12x64xbf16>
    %cst_13 = arith.constant dense<0.000000e+00> : vector<32x64xf32>
    %27 = tpu.matmul %25, %26, %cst_13 {dimension_numbers = #tpu.dot_dimension_numbers<[1], [0], [0], [1], [0, 0, 1, 1], [], []>} : vector<32x12xbf16>, vector<12x64xbf16>, vector<32x64xf32> -> vector<32x64xf32>
    %c0_14 = arith.constant 0 : index
    %c0_15 = arith.constant 0 : index
    %28 = vector.load %arg2[%c0_14, %c0_15] : memref<24x64xf32, #tpu.memory_space<vmem>>, vector<1x64xf32>
    %29 = vector.broadcast %28 : vector<1x64xf32> to vector<32x64xf32>
    %30 = arith.addf %27, %29 : vector<32x64xf32>
    %cst_16 = arith.constant 0.000000e+00 : f32
    %31 = vector.broadcast %cst_16 : f32 to vector<32x64xf32>
    %32 = arith.maximumf %30, %31 : vector<32x64xf32>
    %c2_i32_17 = arith.constant 2 : i32
    %33 = tpu.dynamic_rotate %32 by %c2_i32_17 dim 0 : vector<32x64xf32>, i32 -> vector<32x64xf32>
    %cst_18 = arith.constant 0.000000e+00 : f32
    %34 = vector.broadcast %cst_18 : f32 to vector<32x64xf32>
    %35 = vector.shape_cast %5 : vector<32x1xi1> to vector<32x1xi1>
    %36 = vector.broadcast %35 : vector<32x1xi1> to vector<32x64xi1>
    %37 = arith.select %36, %33, %34 : vector<32x64xi1>, vector<32x64xf32>
    %c0_19 = arith.constant 0 : index
    %c0_20 = arith.constant 0 : index
    %38 = vector.load %arg4[%c0_19, %c0_20] : memref<32x192xf32, #tpu.memory_space<vmem>>, vector<32x64xf32>
    tpu.vector_store %arg4[%c0_19, %c0_20], %37 {strides = array<i32>} : memref<32x192xf32, #tpu.memory_space<vmem>>, vector<32x64xf32>,
    %c1_i32_21 = arith.constant 1 : i32
    %39 = tpu.dynamic_rotate %32 by %c1_i32_21 dim 0 : vector<32x64xf32>, i32 -> vector<32x64xf32>
    %cst_22 = arith.constant 0.000000e+00 : f32
    %40 = vector.broadcast %cst_22 : f32 to vector<32x64xf32>
    %41 = vector.shape_cast %16 : vector<32x1xi1> to vector<32x1xi1>
    %42 = vector.broadcast %41 : vector<32x1xi1> to vector<32x64xi1>
    %43 = arith.select %42, %39, %40 : vector<32x64xi1>, vector<32x64xf32>
    %c0_23 = arith.constant 0 : index
    %c64 = arith.constant 64 : index
    %44 = vector.load %arg4[%c0_23, %c64] : memref<32x192xf32, #tpu.memory_space<vmem>>, vector<32x64xf32>
    tpu.vector_store %arg4[%c0_23, %c64], %43 {strides = array<i32>} : memref<32x192xf32, #tpu.memory_space<vmem>>, vector<32x64xf32>,
    %c0_24 = arith.constant 0 : index
    %c128 = arith.constant 128 : index
    %45 = vector.load %arg4[%c0_24, %c128] : memref<32x192xf32, #tpu.memory_space<vmem>>, vector<32x64xf32>
    tpu.vector_store %arg4[%c0_24, %c128], %32 {strides = array<i32>} : memref<32x192xf32, #tpu.memory_space<vmem>>, vector<32x64xf32>,
    %c0_25 = arith.constant 0 : index
    %c0_26 = arith.constant 0 : index
    %46 = vector.load %arg4[%c0_25, %c0_26] : memref<32x192xf32, #tpu.memory_space<vmem>>, vector<32x192xf32>
    %47 = arith.truncf %46 : vector<32x192xf32> to vector<32x192xbf16>
    %c16 = arith.constant 16 : index
    %c0_27 = arith.constant 0 : index
    %48 = vector.load %arg1[%c16, %c0_27] : memref<1600x64xbf16, #tpu.memory_space<vmem>>, vector<192x64xbf16>
    %cst_28 = arith.constant dense<0.000000e+00> : vector<32x64xf32>
    %49 = tpu.matmul %47, %48, %cst_28 {dimension_numbers = #tpu.dot_dimension_numbers<[1], [0], [0], [1], [0, 0, 1, 1], [], []>} : vector<32x192xbf16>, vector<192x64xbf16>, vector<32x64xf32> -> vector<32x64xf32>
    %c1 = arith.constant 1 : index
    %c0_29 = arith.constant 0 : index
    %50 = vector.load %arg2[%c1, %c0_29] : memref<24x64xf32, #tpu.memory_space<vmem>>, vector<1x64xf32>
    %51 = vector.broadcast %50 : vector<1x64xf32> to vector<32x64xf32>
    %52 = arith.addf %49, %51 : vector<32x64xf32>
    %cst_30 = arith.constant 0.000000e+00 : f32
    %53 = vector.broadcast %cst_30 : f32 to vector<32x64xf32>
    %54 = arith.maximumf %52, %53 : vector<32x64xf32>
    %c208 = arith.constant 208 : index
    %c0_31 = arith.constant 0 : index
    %55 = vector.load %arg1[%c208, %c0_31] : memref<1600x64xbf16, #tpu.memory_space<vmem>>, vector<4x64xbf16>
    %56 = arith.truncf %0 : vector<32x4xf32> to vector<32x4xbf16>
    %cst_32 = arith.constant dense<0.000000e+00> : vector<32x64xf32>
    %57 = tpu.matmul %56, %55, %cst_32 {dimension_numbers = #tpu.dot_dimension_numbers<[1], [0], [0], [1], [0, 0, 1, 1], [], []>} : vector<32x4xbf16>, vector<4x64xbf16>, vector<32x64xf32> -> vector<32x64xf32>
    %c2 = arith.constant 2 : index
    %c0_33 = arith.constant 0 : index
    %58 = vector.load %arg2[%c2, %c0_33] : memref<24x64xf32, #tpu.memory_space<vmem>>, vector<1x64xf32>
    %59 = vector.broadcast %58 : vector<1x64xf32> to vector<32x64xf32>
    %60 = arith.addf %57, %59 : vector<32x64xf32>
    %61 = arith.addf %54, %60 : vector<32x64xf32>
    %cst_34 = arith.constant 0.000000e+00 : f32
    %62 = vector.broadcast %cst_34 : f32 to vector<32x64xf32>
    %63 = arith.maximumf %61, %62 : vector<32x64xf32>
    %64 = tpu.iota {dimensions = array<i32: 0>} : vector<32x1xi32>
    %c15_i32_35 = arith.constant 15 : i32
    %65 = vector.broadcast %c15_i32_35 : i32 to vector<32x1xi32>
    %66 = arith.andi %64, %65 : vector<32x1xi32>
    %c4_i32 = arith.constant 4 : i32
    %67 = vector.broadcast %c4_i32 : i32 to vector<32x1xi32>
    %68 = arith.cmpi sge, %66, %67 : vector<32x1xi32>
    %c4_i32_36 = arith.constant 4 : i32
    %69 = tpu.dynamic_rotate %63 by %c4_i32_36 dim 0 : vector<32x64xf32>, i32 -> vector<32x64xf32>
    %cst_37 = arith.constant 0.000000e+00 : f32
    %70 = vector.broadcast %cst_37 : f32 to vector<32x64xf32>
    %71 = vector.shape_cast %68 : vector<32x1xi1> to vector<32x1xi1>
    %72 = vector.broadcast %71 : vector<32x1xi1> to vector<32x64xi1>
    %73 = arith.select %72, %69, %70 : vector<32x64xi1>, vector<32x64xf32>
    %c0_38 = arith.constant 0 : index
    %c0_39 = arith.constant 0 : index
    %74 = vector.load %arg4[%c0_38, %c0_39] : memref<32x192xf32, #tpu.memory_space<vmem>>, vector<32x64xf32>
    tpu.vector_store %arg4[%c0_38, %c0_39], %73 {strides = array<i32>} : memref<32x192xf32, #tpu.memory_space<vmem>>, vector<32x64xf32>,
    %c2_i32_40 = arith.constant 2 : i32
    %75 = tpu.dynamic_rotate %63 by %c2_i32_40 dim 0 : vector<32x64xf32>, i32 -> vector<32x64xf32>
    %cst_41 = arith.constant 0.000000e+00 : f32
    %76 = vector.broadcast %cst_41 : f32 to vector<32x64xf32>
    %77 = vector.shape_cast %5 : vector<32x1xi1> to vector<32x1xi1>
    %78 = vector.broadcast %77 : vector<32x1xi1> to vector<32x64xi1>
    %79 = arith.select %78, %75, %76 : vector<32x64xi1>, vector<32x64xf32>
    %c0_42 = arith.constant 0 : index
    %c64_43 = arith.constant 64 : index
    %80 = vector.load %arg4[%c0_42, %c64_43] : memref<32x192xf32, #tpu.memory_space<vmem>>, vector<32x64xf32>
    tpu.vector_store %arg4[%c0_42, %c64_43], %79 {strides = array<i32>} : memref<32x192xf32, #tpu.memory_space<vmem>>, vector<32x64xf32>,
    %c0_44 = arith.constant 0 : index
    %c128_45 = arith.constant 128 : index
    %81 = vector.load %arg4[%c0_44, %c128_45] : memref<32x192xf32, #tpu.memory_space<vmem>>, vector<32x64xf32>
    tpu.vector_store %arg4[%c0_44, %c128_45], %63 {strides = array<i32>} : memref<32x192xf32, #tpu.memory_space<vmem>>, vector<32x64xf32>,
    %c0_46 = arith.constant 0 : index
    %c0_47 = arith.constant 0 : index
    %82 = vector.load %arg4[%c0_46, %c0_47] : memref<32x192xf32, #tpu.memory_space<vmem>>, vector<32x192xf32>
    %83 = arith.truncf %82 : vector<32x192xf32> to vector<32x192xbf16>
    %c224 = arith.constant 224 : index
    %c0_48 = arith.constant 0 : index
    %84 = vector.load %arg1[%c224, %c0_48] : memref<1600x64xbf16, #tpu.memory_space<vmem>>, vector<192x32xbf16>
    %cst_49 = arith.constant dense<0.000000e+00> : vector<32x32xf32>
    %85 = tpu.matmul %83, %84, %cst_49 {dimension_numbers = #tpu.dot_dimension_numbers<[1], [0], [0], [1], [0, 0, 1, 1], [], []>} : vector<32x192xbf16>, vector<192x32xbf16>, vector<32x32xf32> -> vector<32x32xf32>
    %c3 = arith.constant 3 : index
    %c0_50 = arith.constant 0 : index
    %86 = vector.load %arg2[%c3, %c0_50] : memref<24x64xf32, #tpu.memory_space<vmem>>, vector<1x32xf32>
    %87 = vector.broadcast %86 : vector<1x32xf32> to vector<32x32xf32>
    %88 = arith.addf %85, %87 : vector<32x32xf32>
    %cst_51 = arith.constant 0.000000e+00 : f32
    %89 = vector.broadcast %cst_51 : f32 to vector<32x32xf32>
    %90 = arith.maximumf %88, %89 : vector<32x32xf32>
    %c4_i32_52 = arith.constant 4 : i32
    %91 = tpu.dynamic_rotate %90 by %c4_i32_52 dim 0 : vector<32x32xf32>, i32 -> vector<32x32xf32>
    %cst_53 = arith.constant 0.000000e+00 : f32
    %92 = vector.broadcast %cst_53 : f32 to vector<32x32xf32>
    %93 = vector.shape_cast %68 : vector<32x1xi1> to vector<32x1xi1>
    %94 = vector.broadcast %93 : vector<32x1xi1> to vector<32x32xi1>
    %95 = arith.select %94, %91, %92 : vector<32x32xi1>, vector<32x32xf32>
    %c0_54 = arith.constant 0 : index
    %c0_55 = arith.constant 0 : index
    %96 = vector.load %arg4[%c0_54, %c0_55] : memref<32x192xf32, #tpu.memory_space<vmem>>, vector<32x32xf32>
    tpu.vector_store %arg4[%c0_54, %c0_55], %95 {strides = array<i32>} : memref<32x192xf32, #tpu.memory_space<vmem>>, vector<32x32xf32>,
    %c2_i32_56 = arith.constant 2 : i32
    %97 = tpu.dynamic_rotate %90 by %c2_i32_56 dim 0 : vector<32x32xf32>, i32 -> vector<32x32xf32>
    %cst_57 = arith.constant 0.000000e+00 : f32
    %98 = vector.broadcast %cst_57 : f32 to vector<32x32xf32>
    %99 = vector.shape_cast %5 : vector<32x1xi1> to vector<32x1xi1>
    %100 = vector.broadcast %99 : vector<32x1xi1> to vector<32x32xi1>
    %101 = arith.select %100, %97, %98 : vector<32x32xi1>, vector<32x32xf32>
    %c0_58 = arith.constant 0 : index
    %c32 = arith.constant 32 : index
    %102 = vector.load %arg4[%c0_58, %c32] : memref<32x192xf32, #tpu.memory_space<vmem>>, vector<32x32xf32>
    tpu.vector_store %arg4[%c0_58, %c32], %101 {strides = array<i32>} : memref<32x192xf32, #tpu.memory_space<vmem>>, vector<32x32xf32>,
    %c0_59 = arith.constant 0 : index
    %c64_60 = arith.constant 64 : index
    %103 = vector.load %arg4[%c0_59, %c64_60] : memref<32x192xf32, #tpu.memory_space<vmem>>, vector<32x32xf32>
    tpu.vector_store %arg4[%c0_59, %c64_60], %90 {strides = array<i32>} : memref<32x192xf32, #tpu.memory_space<vmem>>, vector<32x32xf32>,
    %c0_61 = arith.constant 0 : index
    %c0_62 = arith.constant 0 : index
    %104 = vector.load %arg4[%c0_61, %c0_62] : memref<32x192xf32, #tpu.memory_space<vmem>>, vector<32x96xf32>
    %105 = arith.truncf %104 : vector<32x96xf32> to vector<32x96xbf16>
    %c416 = arith.constant 416 : index
    %c0_63 = arith.constant 0 : index
    %106 = vector.load %arg1[%c416, %c0_63] : memref<1600x64xbf16, #tpu.memory_space<vmem>>, vector<96x32xbf16>
    %cst_64 = arith.constant dense<0.000000e+00> : vector<32x32xf32>
    %107 = tpu.matmul %105, %106, %cst_64 {dimension_numbers = #tpu.dot_dimension_numbers<[1], [0], [0], [1], [0, 0, 1, 1], [], []>} : vector<32x96xbf16>, vector<96x32xbf16>, vector<32x32xf32> -> vector<32x32xf32>
    %c4_65 = arith.constant 4 : index
    %c0_66 = arith.constant 0 : index
    %108 = vector.load %arg2[%c4_65, %c0_66] : memref<24x64xf32, #tpu.memory_space<vmem>>, vector<1x32xf32>
    %109 = vector.broadcast %108 : vector<1x32xf32> to vector<32x32xf32>
    %110 = arith.addf %107, %109 : vector<32x32xf32>
    %cst_67 = arith.constant 0.000000e+00 : f32
    %111 = vector.broadcast %cst_67 : f32 to vector<32x32xf32>
    %112 = arith.maximumf %110, %111 : vector<32x32xf32>
    %c512 = arith.constant 512 : index
    %c0_68 = arith.constant 0 : index
    %113 = vector.load %arg1[%c512, %c0_68] : memref<1600x64xbf16, #tpu.memory_space<vmem>>, vector<64x32xbf16>
    %114 = arith.truncf %63 : vector<32x64xf32> to vector<32x64xbf16>
    %cst_69 = arith.constant dense<0.000000e+00> : vector<32x32xf32>
    %115 = tpu.matmul %114, %113, %cst_69 {dimension_numbers = #tpu.dot_dimension_numbers<[1], [0], [0], [1], [0, 0, 1, 1], [], []>} : vector<32x64xbf16>, vector<64x32xbf16>, vector<32x32xf32> -> vector<32x32xf32>
    %c5 = arith.constant 5 : index
    %c0_70 = arith.constant 0 : index
    %116 = vector.load %arg2[%c5, %c0_70] : memref<24x64xf32, #tpu.memory_space<vmem>>, vector<1x32xf32>
    %117 = vector.broadcast %116 : vector<1x32xf32> to vector<32x32xf32>
    %118 = arith.addf %115, %117 : vector<32x32xf32>
    %119 = arith.addf %112, %118 : vector<32x32xf32>
    %cst_71 = arith.constant 0.000000e+00 : f32
    %120 = vector.broadcast %cst_71 : f32 to vector<32x32xf32>
    %121 = arith.maximumf %119, %120 : vector<32x32xf32>
    %122 = tpu.iota {dimensions = array<i32: 0>} : vector<32x1xi32>
    %c15_i32_72 = arith.constant 15 : i32
    %123 = vector.broadcast %c15_i32_72 : i32 to vector<32x1xi32>
    %124 = arith.andi %122, %123 : vector<32x1xi32>
    %c8_i32 = arith.constant 8 : i32
    %125 = vector.broadcast %c8_i32 : i32 to vector<32x1xi32>
    %126 = arith.cmpi sge, %124, %125 : vector<32x1xi32>
    %c8_i32_73 = arith.constant 8 : i32
    %127 = tpu.dynamic_rotate %121 by %c8_i32_73 dim 0 : vector<32x32xf32>, i32 -> vector<32x32xf32>
    %cst_74 = arith.constant 0.000000e+00 : f32
    %128 = vector.broadcast %cst_74 : f32 to vector<32x32xf32>
    %129 = vector.shape_cast %126 : vector<32x1xi1> to vector<32x1xi1>
    %130 = vector.broadcast %129 : vector<32x1xi1> to vector<32x32xi1>
    %131 = arith.select %130, %127, %128 : vector<32x32xi1>, vector<32x32xf32>
    %c0_75 = arith.constant 0 : index
    %c0_76 = arith.constant 0 : index
    %132 = vector.load %arg4[%c0_75, %c0_76] : memref<32x192xf32, #tpu.memory_space<vmem>>, vector<32x32xf32>
    tpu.vector_store %arg4[%c0_75, %c0_76], %131 {strides = array<i32>} : memref<32x192xf32, #tpu.memory_space<vmem>>, vector<32x32xf32>,
    %c4_i32_77 = arith.constant 4 : i32
    %133 = tpu.dynamic_rotate %121 by %c4_i32_77 dim 0 : vector<32x32xf32>, i32 -> vector<32x32xf32>
    %cst_78 = arith.constant 0.000000e+00 : f32
    %134 = vector.broadcast %cst_78 : f32 to vector<32x32xf32>
    %135 = vector.shape_cast %68 : vector<32x1xi1> to vector<32x1xi1>
    %136 = vector.broadcast %135 : vector<32x1xi1> to vector<32x32xi1>
    %137 = arith.select %136, %133, %134 : vector<32x32xi1>, vector<32x32xf32>
    %c0_79 = arith.constant 0 : index
    %c32_80 = arith.constant 32 : index
    %138 = vector.load %arg4[%c0_79, %c32_80] : memref<32x192xf32, #tpu.memory_space<vmem>>, vector<32x32xf32>
    tpu.vector_store %arg4[%c0_79, %c32_80], %137 {strides = array<i32>} : memref<32x192xf32, #tpu.memory_space<vmem>>, vector<32x32xf32>,
    %c0_81 = arith.constant 0 : index
    %c64_82 = arith.constant 64 : index
    %139 = vector.load %arg4[%c0_81, %c64_82] : memref<32x192xf32, #tpu.memory_space<vmem>>, vector<32x32xf32>
    tpu.vector_store %arg4[%c0_81, %c64_82], %121 {strides = array<i32>} : memref<32x192xf32, #tpu.memory_space<vmem>>, vector<32x32xf32>,
    %c0_83 = arith.constant 0 : index
    %c0_84 = arith.constant 0 : index
    %140 = vector.load %arg4[%c0_83, %c0_84] : memref<32x192xf32, #tpu.memory_space<vmem>>, vector<32x96xf32>
    %141 = arith.truncf %140 : vector<32x96xf32> to vector<32x96xbf16>
    %c576 = arith.constant 576 : index
    %c0_85 = arith.constant 0 : index
    %142 = vector.load %arg1[%c576, %c0_85] : memref<1600x64xbf16, #tpu.memory_space<vmem>>, vector<96x16xbf16>
    %cst_86 = arith.constant dense<0.000000e+00> : vector<32x16xf32>
    %143 = tpu.matmul %141, %142, %cst_86 {dimension_numbers = #tpu.dot_dimension_numbers<[1], [0], [0], [1], [0, 0, 1, 1], [], []>} : vector<32x96xbf16>, vector<96x16xbf16>, vector<32x16xf32> -> vector<32x16xf32>
    %c6 = arith.constant 6 : index
    %c0_87 = arith.constant 0 : index
    %144 = vector.load %arg2[%c6, %c0_87] : memref<24x64xf32, #tpu.memory_space<vmem>>, vector<1x16xf32>
    %145 = vector.broadcast %144 : vector<1x16xf32> to vector<32x16xf32>
    %146 = arith.addf %143, %145 : vector<32x16xf32>
    %cst_88 = arith.constant 0.000000e+00 : f32
    %147 = vector.broadcast %cst_88 : f32 to vector<32x16xf32>
    %148 = arith.maximumf %146, %147 : vector<32x16xf32>
    %c8_i32_89 = arith.constant 8 : i32
    %149 = tpu.dynamic_rotate %148 by %c8_i32_89 dim 0 : vector<32x16xf32>, i32 -> vector<32x16xf32>
    %cst_90 = arith.constant 0.000000e+00 : f32
    %150 = vector.broadcast %cst_90 : f32 to vector<32x16xf32>
    %151 = vector.shape_cast %126 : vector<32x1xi1> to vector<32x1xi1>
    %152 = vector.broadcast %151 : vector<32x1xi1> to vector<32x16xi1>
    %153 = arith.select %152, %149, %150 : vector<32x16xi1>, vector<32x16xf32>
    %c0_91 = arith.constant 0 : index
    %c0_92 = arith.constant 0 : index
    %154 = vector.load %arg4[%c0_91, %c0_92] : memref<32x192xf32, #tpu.memory_space<vmem>>, vector<32x16xf32>
    tpu.vector_store %arg4[%c0_91, %c0_92], %153 {strides = array<i32>} : memref<32x192xf32, #tpu.memory_space<vmem>>, vector<32x16xf32>,
    %c4_i32_93 = arith.constant 4 : i32
    %155 = tpu.dynamic_rotate %148 by %c4_i32_93 dim 0 : vector<32x16xf32>, i32 -> vector<32x16xf32>
    %cst_94 = arith.constant 0.000000e+00 : f32
    %156 = vector.broadcast %cst_94 : f32 to vector<32x16xf32>
    %157 = vector.shape_cast %68 : vector<32x1xi1> to vector<32x1xi1>
    %158 = vector.broadcast %157 : vector<32x1xi1> to vector<32x16xi1>
    %159 = arith.select %158, %155, %156 : vector<32x16xi1>, vector<32x16xf32>
    %c0_95 = arith.constant 0 : index
    %c16_96 = arith.constant 16 : index
    %160 = vector.load %arg4[%c0_95, %c16_96] : memref<32x192xf32, #tpu.memory_space<vmem>>, vector<32x16xf32>
    tpu.vector_store %arg4[%c0_95, %c16_96], %159 {strides = array<i32>} : memref<32x192xf32, #tpu.memory_space<vmem>>, vector<32x16xf32>,
    %c0_97 = arith.constant 0 : index
    %c32_98 = arith.constant 32 : index
    %161 = vector.load %arg4[%c0_97, %c32_98] : memref<32x192xf32, #tpu.memory_space<vmem>>, vector<32x16xf32>
    tpu.vector_store %arg4[%c0_97, %c32_98], %148 {strides = array<i32>} : memref<32x192xf32, #tpu.memory_space<vmem>>, vector<32x16xf32>,
    %c0_99 = arith.constant 0 : index
    %c0_100 = arith.constant 0 : index
    %162 = vector.load %arg4[%c0_99, %c0_100] : memref<32x192xf32, #tpu.memory_space<vmem>>, vector<32x48xf32>
    %163 = arith.truncf %162 : vector<32x48xf32> to vector<32x48xbf16>
    %c672 = arith.constant 672 : index
    %c0_101 = arith.constant 0 : index
    %164 = vector.load %arg1[%c672, %c0_101] : memref<1600x64xbf16, #tpu.memory_space<vmem>>, vector<48x16xbf16>
    %cst_102 = arith.constant dense<0.000000e+00> : vector<32x16xf32>
    %165 = tpu.matmul %163, %164, %cst_102 {dimension_numbers = #tpu.dot_dimension_numbers<[1], [0], [0], [1], [0, 0, 1, 1], [], []>} : vector<32x48xbf16>, vector<48x16xbf16>, vector<32x16xf32> -> vector<32x16xf32>
    %c7 = arith.constant 7 : index
    %c0_103 = arith.constant 0 : index
    %166 = vector.load %arg2[%c7, %c0_103] : memref<24x64xf32, #tpu.memory_space<vmem>>, vector<1x16xf32>
    %167 = vector.broadcast %166 : vector<1x16xf32> to vector<32x16xf32>
    %168 = arith.addf %165, %167 : vector<32x16xf32>
    %cst_104 = arith.constant 0.000000e+00 : f32
    %169 = vector.broadcast %cst_104 : f32 to vector<32x16xf32>
    %170 = arith.maximumf %168, %169 : vector<32x16xf32>
    %c720 = arith.constant 720 : index
    %c0_105 = arith.constant 0 : index
    %171 = vector.load %arg1[%c720, %c0_105] : memref<1600x64xbf16, #tpu.memory_space<vmem>>, vector<32x16xbf16>
    %172 = arith.truncf %121 : vector<32x32xf32> to vector<32x32xbf16>
    %cst_106 = arith.constant dense<0.000000e+00> : vector<32x16xf32>
    %173 = tpu.matmul %172, %171, %cst_106 {dimension_numbers = #tpu.dot_dimension_numbers<[1], [0], [0], [1], [0, 0, 1, 1], [], []>} : vector<32x32xbf16>, vector<32x16xbf16>, vector<32x16xf32> -> vector<32x16xf32>
    %c8_107 = arith.constant 8 : index
    %c0_108 = arith.constant 0 : index
    %174 = vector.load %arg2[%c8_107, %c0_108] : memref<24x64xf32, #tpu.memory_space<vmem>>, vector<1x16xf32>
    %175 = vector.broadcast %174 : vector<1x16xf32> to vector<32x16xf32>
    %176 = arith.addf %173, %175 : vector<32x16xf32>
    %177 = arith.addf %170, %176 : vector<32x16xf32>
    %cst_109 = arith.constant 0.000000e+00 : f32
    %178 = vector.broadcast %cst_109 : f32 to vector<32x16xf32>
    %179 = arith.maximumf %177, %178 : vector<32x16xf32>
    %c9 = arith.constant 9 : index
    %c0_110 = arith.constant 0 : index
    %180 = vector.load %arg2[%c9, %c0_110] : memref<24x64xf32, #tpu.memory_space<vmem>>, vector<1x16xf32>
    %181 = vector.broadcast %180 : vector<1x16xf32> to vector<32x16xf32>
    %182 = arith.mulf %179, %181 : vector<32x16xf32>
    %c10 = arith.constant 10 : index
    %c0_111 = arith.constant 0 : index
    %183 = vector.load %arg2[%c10, %c0_111] : memref<24x64xf32, #tpu.memory_space<vmem>>, vector<1x16xf32>
    %184 = vector.broadcast %183 : vector<1x16xf32> to vector<32x16xf32>
    %185 = arith.addf %182, %184 : vector<32x16xf32>
    %c0_112 = arith.constant 0 : index
    %c0_113 = arith.constant 0 : index
    %186 = vector.load %arg5[%c0_112, %c0_113] : memref<32x16xf32, #tpu.memory_space<vmem>>, vector<32x16xf32>
    tpu.vector_store %arg5[%c0_112, %c0_113], %185 {strides = array<i32>} : memref<32x16xf32, #tpu.memory_space<vmem>>, vector<32x16xf32>,
    %c0_114 = arith.constant 0 : index
    %c0_115 = arith.constant 0 : index
    %187 = tpu.strided_load %arg5[%c0_114, %c0_115] {strides = array<i32: 2, 1>} : memref<32x16xf32, #tpu.memory_space<vmem>>, vector<16x16xf32>
    %c1_116 = arith.constant 1 : index
    %c0_117 = arith.constant 0 : index
    %188 = tpu.strided_load %arg5[%c1_116, %c0_117] {strides = array<i32: 2, 1>} : memref<32x16xf32, #tpu.memory_space<vmem>>, vector<16x16xf32>
    %189 = arith.maximumf %187, %188 : vector<16x16xf32>
    %190 = tpu.iota {dimensions = array<i32: 0>} : vector<16x1xi32>
    %c7_i32 = arith.constant 7 : i32
    %191 = vector.broadcast %c7_i32 : i32 to vector<16x1xi32>
    %192 = arith.andi %190, %191 : vector<16x1xi32>
    %c2_i32_118 = arith.constant 2 : i32
    %193 = vector.broadcast %c2_i32_118 : i32 to vector<16x1xi32>
    %194 = arith.cmpi sge, %192, %193 : vector<16x1xi32>
    %c2_i32_119 = arith.constant 2 : i32
    %195 = tpu.dynamic_rotate %189 by %c2_i32_119 dim 0 : vector<16x16xf32>, i32 -> vector<16x16xf32>
    %cst_120 = arith.constant 0.000000e+00 : f32
    %196 = vector.broadcast %cst_120 : f32 to vector<16x16xf32>
    %197 = vector.shape_cast %194 : vector<16x1xi1> to vector<16x1xi1>
    %198 = vector.broadcast %197 : vector<16x1xi1> to vector<16x16xi1>
    %199 = arith.select %198, %195, %196 : vector<16x16xi1>, vector<16x16xf32>
    %c0_121 = arith.constant 0 : index
    %c0_122 = arith.constant 0 : index
    %200 = vector.load %arg4[%c0_121, %c0_122] : memref<32x192xf32, #tpu.memory_space<vmem>>, vector<16x16xf32>
    tpu.vector_store %arg4[%c0_121, %c0_122], %199 {strides = array<i32>} : memref<32x192xf32, #tpu.memory_space<vmem>>, vector<16x16xf32>,
    %201 = tpu.iota {dimensions = array<i32: 0>} : vector<16x1xi32>
    %c7_i32_123 = arith.constant 7 : i32
    %202 = vector.broadcast %c7_i32_123 : i32 to vector<16x1xi32>
    %203 = arith.andi %201, %202 : vector<16x1xi32>
    %c1_i32_124 = arith.constant 1 : i32
    %204 = vector.broadcast %c1_i32_124 : i32 to vector<16x1xi32>
    %205 = arith.cmpi sge, %203, %204 : vector<16x1xi32>
    %c1_i32_125 = arith.constant 1 : i32
    %206 = tpu.dynamic_rotate %189 by %c1_i32_125 dim 0 : vector<16x16xf32>, i32 -> vector<16x16xf32>
    %cst_126 = arith.constant 0.000000e+00 : f32
    %207 = vector.broadcast %cst_126 : f32 to vector<16x16xf32>
    %208 = vector.shape_cast %205 : vector<16x1xi1> to vector<16x1xi1>
    %209 = vector.broadcast %208 : vector<16x1xi1> to vector<16x16xi1>
    %210 = arith.select %209, %206, %207 : vector<16x16xi1>, vector<16x16xf32>
    %c0_127 = arith.constant 0 : index
    %c16_128 = arith.constant 16 : index
    %211 = vector.load %arg4[%c0_127, %c16_128] : memref<32x192xf32, #tpu.memory_space<vmem>>, vector<16x16xf32>
    tpu.vector_store %arg4[%c0_127, %c16_128], %210 {strides = array<i32>} : memref<32x192xf32, #tpu.memory_space<vmem>>, vector<16x16xf32>,
    %c0_129 = arith.constant 0 : index
    %c32_130 = arith.constant 32 : index
    %212 = vector.load %arg4[%c0_129, %c32_130] : memref<32x192xf32, #tpu.memory_space<vmem>>, vector<16x16xf32>
    tpu.vector_store %arg4[%c0_129, %c32_130], %189 {strides = array<i32>} : memref<32x192xf32, #tpu.memory_space<vmem>>, vector<16x16xf32>,
    %c0_131 = arith.constant 0 : index
    %c0_132 = arith.constant 0 : index
    %213 = vector.load %arg4[%c0_131, %c0_132] : memref<32x192xf32, #tpu.memory_space<vmem>>, vector<16x48xf32>
    %214 = arith.truncf %213 : vector<16x48xf32> to vector<16x48xbf16>
    %c752 = arith.constant 752 : index
    %c0_133 = arith.constant 0 : index
    %215 = vector.load %arg1[%c752, %c0_133] : memref<1600x64xbf16, #tpu.memory_space<vmem>>, vector<48x64xbf16>
    %cst_134 = arith.constant dense<0.000000e+00> : vector<16x64xf32>
    %216 = tpu.matmul %214, %215, %cst_134 {dimension_numbers = #tpu.dot_dimension_numbers<[1], [0], [0], [1], [0, 0, 1, 1], [], []>} : vector<16x48xbf16>, vector<48x64xbf16>, vector<16x64xf32> -> vector<16x64xf32>
    %c11 = arith.constant 11 : index
    %c0_135 = arith.constant 0 : index
    %217 = vector.load %arg2[%c11, %c0_135] : memref<24x64xf32, #tpu.memory_space<vmem>>, vector<1x64xf32>
    %218 = vector.broadcast %217 : vector<1x64xf32> to vector<16x64xf32>
    %219 = arith.addf %216, %218 : vector<16x64xf32>
    %cst_136 = arith.constant 0.000000e+00 : f32
    %220 = vector.broadcast %cst_136 : f32 to vector<16x64xf32>
    %221 = arith.maximumf %219, %220 : vector<16x64xf32>
    %c2_i32_137 = arith.constant 2 : i32
    %222 = tpu.dynamic_rotate %221 by %c2_i32_137 dim 0 : vector<16x64xf32>, i32 -> vector<16x64xf32>
    %cst_138 = arith.constant 0.000000e+00 : f32
    %223 = vector.broadcast %cst_138 : f32 to vector<16x64xf32>
    %224 = vector.shape_cast %194 : vector<16x1xi1> to vector<16x1xi1>
    %225 = vector.broadcast %224 : vector<16x1xi1> to vector<16x64xi1>
    %226 = arith.select %225, %222, %223 : vector<16x64xi1>, vector<16x64xf32>
    %c0_139 = arith.constant 0 : index
    %c0_140 = arith.constant 0 : index
    %227 = vector.load %arg4[%c0_139, %c0_140] : memref<32x192xf32, #tpu.memory_space<vmem>>, vector<16x64xf32>
    tpu.vector_store %arg4[%c0_139, %c0_140], %226 {strides = array<i32>} : memref<32x192xf32, #tpu.memory_space<vmem>>, vector<16x64xf32>,
    %c1_i32_141 = arith.constant 1 : i32
    %228 = tpu.dynamic_rotate %221 by %c1_i32_141 dim 0 : vector<16x64xf32>, i32 -> vector<16x64xf32>
    %cst_142 = arith.constant 0.000000e+00 : f32
    %229 = vector.broadcast %cst_142 : f32 to vector<16x64xf32>
    %230 = vector.shape_cast %205 : vector<16x1xi1> to vector<16x1xi1>
    %231 = vector.broadcast %230 : vector<16x1xi1> to vector<16x64xi1>
    %232 = arith.select %231, %228, %229 : vector<16x64xi1>, vector<16x64xf32>
    %c0_143 = arith.constant 0 : index
    %c64_144 = arith.constant 64 : index
    %233 = vector.load %arg4[%c0_143, %c64_144] : memref<32x192xf32, #tpu.memory_space<vmem>>, vector<16x64xf32>
    tpu.vector_store %arg4[%c0_143, %c64_144], %232 {strides = array<i32>} : memref<32x192xf32, #tpu.memory_space<vmem>>, vector<16x64xf32>,
    %c0_145 = arith.constant 0 : index
    %c128_146 = arith.constant 128 : index
    %234 = vector.load %arg4[%c0_145, %c128_146] : memref<32x192xf32, #tpu.memory_space<vmem>>, vector<16x64xf32>
    tpu.vector_store %arg4[%c0_145, %c128_146], %221 {strides = array<i32>} : memref<32x192xf32, #tpu.memory_space<vmem>>, vector<16x64xf32>,
    %c0_147 = arith.constant 0 : index
    %c0_148 = arith.constant 0 : index
    %235 = vector.load %arg4[%c0_147, %c0_148] : memref<32x192xf32, #tpu.memory_space<vmem>>, vector<16x192xf32>
    %236 = arith.truncf %235 : vector<16x192xf32> to vector<16x192xbf16>
    %c800 = arith.constant 800 : index
    %c0_149 = arith.constant 0 : index
    %237 = vector.load %arg1[%c800, %c0_149] : memref<1600x64xbf16, #tpu.memory_space<vmem>>, vector<192x64xbf16>
    %cst_150 = arith.constant dense<0.000000e+00> : vector<16x64xf32>
    %238 = tpu.matmul %236, %237, %cst_150 {dimension_numbers = #tpu.dot_dimension_numbers<[1], [0], [0], [1], [0, 0, 1, 1], [], []>} : vector<16x192xbf16>, vector<192x64xbf16>, vector<16x64xf32> -> vector<16x64xf32>
    %c12 = arith.constant 12 : index
    %c0_151 = arith.constant 0 : index
    %239 = vector.load %arg2[%c12, %c0_151] : memref<24x64xf32, #tpu.memory_space<vmem>>, vector<1x64xf32>
    %240 = vector.broadcast %239 : vector<1x64xf32> to vector<16x64xf32>
    %241 = arith.addf %238, %240 : vector<16x64xf32>
    %cst_152 = arith.constant 0.000000e+00 : f32
    %242 = vector.broadcast %cst_152 : f32 to vector<16x64xf32>
    %243 = arith.maximumf %241, %242 : vector<16x64xf32>
    %c992 = arith.constant 992 : index
    %c0_153 = arith.constant 0 : index
    %244 = vector.load %arg1[%c992, %c0_153] : memref<1600x64xbf16, #tpu.memory_space<vmem>>, vector<16x64xbf16>
    %245 = arith.truncf %189 : vector<16x16xf32> to vector<16x16xbf16>
    %cst_154 = arith.constant dense<0.000000e+00> : vector<16x64xf32>
    %246 = tpu.matmul %245, %244, %cst_154 {dimension_numbers = #tpu.dot_dimension_numbers<[1], [0], [0], [1], [0, 0, 1, 1], [], []>} : vector<16x16xbf16>, vector<16x64xbf16>, vector<16x64xf32> -> vector<16x64xf32>
    %c13 = arith.constant 13 : index
    %c0_155 = arith.constant 0 : index
    %247 = vector.load %arg2[%c13, %c0_155] : memref<24x64xf32, #tpu.memory_space<vmem>>, vector<1x64xf32>
    %248 = vector.broadcast %247 : vector<1x64xf32> to vector<16x64xf32>
    %249 = arith.addf %246, %248 : vector<16x64xf32>
    %250 = arith.addf %243, %249 : vector<16x64xf32>
    %cst_156 = arith.constant 0.000000e+00 : f32
    %251 = vector.broadcast %cst_156 : f32 to vector<16x64xf32>
    %252 = arith.maximumf %250, %251 : vector<16x64xf32>
    %253 = tpu.iota {dimensions = array<i32: 0>} : vector<16x1xi32>
    %c7_i32_157 = arith.constant 7 : i32
    %254 = vector.broadcast %c7_i32_157 : i32 to vector<16x1xi32>
    %255 = arith.andi %253, %254 : vector<16x1xi32>
    %c4_i32_158 = arith.constant 4 : i32
    %256 = vector.broadcast %c4_i32_158 : i32 to vector<16x1xi32>
    %257 = arith.cmpi sge, %255, %256 : vector<16x1xi32>
    %c4_i32_159 = arith.constant 4 : i32
    %258 = tpu.dynamic_rotate %252 by %c4_i32_159 dim 0 : vector<16x64xf32>, i32 -> vector<16x64xf32>
    %cst_160 = arith.constant 0.000000e+00 : f32
    %259 = vector.broadcast %cst_160 : f32 to vector<16x64xf32>
    %260 = vector.shape_cast %257 : vector<16x1xi1> to vector<16x1xi1>
    %261 = vector.broadcast %260 : vector<16x1xi1> to vector<16x64xi1>
    %262 = arith.select %261, %258, %259 : vector<16x64xi1>, vector<16x64xf32>
    %c0_161 = arith.constant 0 : index
    %c0_162 = arith.constant 0 : index
    %263 = vector.load %arg4[%c0_161, %c0_162] : memref<32x192xf32, #tpu.memory_space<vmem>>, vector<16x64xf32>
    tpu.vector_store %arg4[%c0_161, %c0_162], %262 {strides = array<i32>} : memref<32x192xf32, #tpu.memory_space<vmem>>, vector<16x64xf32>,
    %c2_i32_163 = arith.constant 2 : i32
    %264 = tpu.dynamic_rotate %252 by %c2_i32_163 dim 0 : vector<16x64xf32>, i32 -> vector<16x64xf32>
    %cst_164 = arith.constant 0.000000e+00 : f32
    %265 = vector.broadcast %cst_164 : f32 to vector<16x64xf32>
    %266 = vector.shape_cast %194 : vector<16x1xi1> to vector<16x1xi1>
    %267 = vector.broadcast %266 : vector<16x1xi1> to vector<16x64xi1>
    %268 = arith.select %267, %264, %265 : vector<16x64xi1>, vector<16x64xf32>
    %c0_165 = arith.constant 0 : index
    %c64_166 = arith.constant 64 : index
    %269 = vector.load %arg4[%c0_165, %c64_166] : memref<32x192xf32, #tpu.memory_space<vmem>>, vector<16x64xf32>
    tpu.vector_store %arg4[%c0_165, %c64_166], %268 {strides = array<i32>} : memref<32x192xf32, #tpu.memory_space<vmem>>, vector<16x64xf32>,
    %c0_167 = arith.constant 0 : index
    %c128_168 = arith.constant 128 : index
    %270 = vector.load %arg4[%c0_167, %c128_168] : memref<32x192xf32, #tpu.memory_space<vmem>>, vector<16x64xf32>
    tpu.vector_store %arg4[%c0_167, %c128_168], %252 {strides = array<i32>} : memref<32x192xf32, #tpu.memory_space<vmem>>, vector<16x64xf32>,
    %c0_169 = arith.constant 0 : index
    %c0_170 = arith.constant 0 : index
    %271 = vector.load %arg4[%c0_169, %c0_170] : memref<32x192xf32, #tpu.memory_space<vmem>>, vector<16x192xf32>
    %272 = arith.truncf %271 : vector<16x192xf32> to vector<16x192xbf16>
    %c1008 = arith.constant 1008 : index
    %c0_171 = arith.constant 0 : index
    %273 = vector.load %arg1[%c1008, %c0_171] : memref<1600x64xbf16, #tpu.memory_space<vmem>>, vector<192x32xbf16>
    %cst_172 = arith.constant dense<0.000000e+00> : vector<16x32xf32>
    %274 = tpu.matmul %272, %273, %cst_172 {dimension_numbers = #tpu.dot_dimension_numbers<[1], [0], [0], [1], [0, 0, 1, 1], [], []>} : vector<16x192xbf16>, vector<192x32xbf16>, vector<16x32xf32> -> vector<16x32xf32>
    %c14 = arith.constant 14 : index
    %c0_173 = arith.constant 0 : index
    %275 = vector.load %arg2[%c14, %c0_173] : memref<24x64xf32, #tpu.memory_space<vmem>>, vector<1x32xf32>
    %276 = vector.broadcast %275 : vector<1x32xf32> to vector<16x32xf32>
    %277 = arith.addf %274, %276 : vector<16x32xf32>
    %cst_174 = arith.constant 0.000000e+00 : f32
    %278 = vector.broadcast %cst_174 : f32 to vector<16x32xf32>
    %279 = arith.maximumf %277, %278 : vector<16x32xf32>
    %c4_i32_175 = arith.constant 4 : i32
    %280 = tpu.dynamic_rotate %279 by %c4_i32_175 dim 0 : vector<16x32xf32>, i32 -> vector<16x32xf32>
    %cst_176 = arith.constant 0.000000e+00 : f32
    %281 = vector.broadcast %cst_176 : f32 to vector<16x32xf32>
    %282 = vector.shape_cast %257 : vector<16x1xi1> to vector<16x1xi1>
    %283 = vector.broadcast %282 : vector<16x1xi1> to vector<16x32xi1>
    %284 = arith.select %283, %280, %281 : vector<16x32xi1>, vector<16x32xf32>
    %c0_177 = arith.constant 0 : index
    %c0_178 = arith.constant 0 : index
    %285 = vector.load %arg4[%c0_177, %c0_178] : memref<32x192xf32, #tpu.memory_space<vmem>>, vector<16x32xf32>
    tpu.vector_store %arg4[%c0_177, %c0_178], %284 {strides = array<i32>} : memref<32x192xf32, #tpu.memory_space<vmem>>, vector<16x32xf32>,
    %c2_i32_179 = arith.constant 2 : i32
    %286 = tpu.dynamic_rotate %279 by %c2_i32_179 dim 0 : vector<16x32xf32>, i32 -> vector<16x32xf32>
    %cst_180 = arith.constant 0.000000e+00 : f32
    %287 = vector.broadcast %cst_180 : f32 to vector<16x32xf32>
    %288 = vector.shape_cast %194 : vector<16x1xi1> to vector<16x1xi1>
    %289 = vector.broadcast %288 : vector<16x1xi1> to vector<16x32xi1>
    %290 = arith.select %289, %286, %287 : vector<16x32xi1>, vector<16x32xf32>
    %c0_181 = arith.constant 0 : index
    %c32_182 = arith.constant 32 : index
    %291 = vector.load %arg4[%c0_181, %c32_182] : memref<32x192xf32, #tpu.memory_space<vmem>>, vector<16x32xf32>
    tpu.vector_store %arg4[%c0_181, %c32_182], %290 {strides = array<i32>} : memref<32x192xf32, #tpu.memory_space<vmem>>, vector<16x32xf32>,
    %c0_183 = arith.constant 0 : index
    %c64_184 = arith.constant 64 : index
    %292 = vector.load %arg4[%c0_183, %c64_184] : memref<32x192xf32, #tpu.memory_space<vmem>>, vector<16x32xf32>
    tpu.vector_store %arg4[%c0_183, %c64_184], %279 {strides = array<i32>} : memref<32x192xf32, #tpu.memory_space<vmem>>, vector<16x32xf32>,
    %c0_185 = arith.constant 0 : index
    %c0_186 = arith.constant 0 : index
    %293 = vector.load %arg4[%c0_185, %c0_186] : memref<32x192xf32, #tpu.memory_space<vmem>>, vector<16x96xf32>
    %294 = arith.truncf %293 : vector<16x96xf32> to vector<16x96xbf16>
    %c1200 = arith.constant 1200 : index
    %c0_187 = arith.constant 0 : index
    %295 = vector.load %arg1[%c1200, %c0_187] : memref<1600x64xbf16, #tpu.memory_space<vmem>>, vector<96x32xbf16>
    %cst_188 = arith.constant dense<0.000000e+00> : vector<16x32xf32>
    %296 = tpu.matmul %294, %295, %cst_188 {dimension_numbers = #tpu.dot_dimension_numbers<[1], [0], [0], [1], [0, 0, 1, 1], [], []>} : vector<16x96xbf16>, vector<96x32xbf16>, vector<16x32xf32> -> vector<16x32xf32>
    %c15 = arith.constant 15 : index
    %c0_189 = arith.constant 0 : index
    %297 = vector.load %arg2[%c15, %c0_189] : memref<24x64xf32, #tpu.memory_space<vmem>>, vector<1x32xf32>
    %298 = vector.broadcast %297 : vector<1x32xf32> to vector<16x32xf32>
    %299 = arith.addf %296, %298 : vector<16x32xf32>
    %cst_190 = arith.constant 0.000000e+00 : f32
    %300 = vector.broadcast %cst_190 : f32 to vector<16x32xf32>
    %301 = arith.maximumf %299, %300 : vector<16x32xf32>
    %c1296 = arith.constant 1296 : index
    %c0_191 = arith.constant 0 : index
    %302 = vector.load %arg1[%c1296, %c0_191] : memref<1600x64xbf16, #tpu.memory_space<vmem>>, vector<64x32xbf16>
    %303 = arith.truncf %252 : vector<16x64xf32> to vector<16x64xbf16>
    %cst_192 = arith.constant dense<0.000000e+00> : vector<16x32xf32>
    %304 = tpu.matmul %303, %302, %cst_192 {dimension_numbers = #tpu.dot_dimension_numbers<[1], [0], [0], [1], [0, 0, 1, 1], [], []>} : vector<16x64xbf16>, vector<64x32xbf16>, vector<16x32xf32> -> vector<16x32xf32>
    %c16_193 = arith.constant 16 : index
    %c0_194 = arith.constant 0 : index
    %305 = vector.load %arg2[%c16_193, %c0_194] : memref<24x64xf32, #tpu.memory_space<vmem>>, vector<1x32xf32>
    %306 = vector.broadcast %305 : vector<1x32xf32> to vector<16x32xf32>
    %307 = arith.addf %304, %306 : vector<16x32xf32>
    %308 = arith.addf %301, %307 : vector<16x32xf32>
    %cst_195 = arith.constant 0.000000e+00 : f32
    %309 = vector.broadcast %cst_195 : f32 to vector<16x32xf32>
    %310 = arith.maximumf %308, %309 : vector<16x32xf32>
    %cst_196 = arith.constant 0.000000e+00 : f32
    %311 = vector.broadcast %cst_196 : f32 to vector<16x32xf32>
    %c0_197 = arith.constant 0 : index
    %c0_198 = arith.constant 0 : index
    %312 = vector.load %arg4[%c0_197, %c0_198] : memref<32x192xf32, #tpu.memory_space<vmem>>, vector<16x32xf32>
    tpu.vector_store %arg4[%c0_197, %c0_198], %311 {strides = array<i32>} : memref<32x192xf32, #tpu.memory_space<vmem>>, vector<16x32xf32>,
    %c4_i32_199 = arith.constant 4 : i32
    %313 = tpu.dynamic_rotate %310 by %c4_i32_199 dim 0 : vector<16x32xf32>, i32 -> vector<16x32xf32>
    %cst_200 = arith.constant 0.000000e+00 : f32
    %314 = vector.broadcast %cst_200 : f32 to vector<16x32xf32>
    %315 = vector.shape_cast %257 : vector<16x1xi1> to vector<16x1xi1>
    %316 = vector.broadcast %315 : vector<16x1xi1> to vector<16x32xi1>
    %317 = arith.select %316, %313, %314 : vector<16x32xi1>, vector<16x32xf32>
    %c0_201 = arith.constant 0 : index
    %c32_202 = arith.constant 32 : index
    %318 = vector.load %arg4[%c0_201, %c32_202] : memref<32x192xf32, #tpu.memory_space<vmem>>, vector<16x32xf32>
    tpu.vector_store %arg4[%c0_201, %c32_202], %317 {strides = array<i32>} : memref<32x192xf32, #tpu.memory_space<vmem>>, vector<16x32xf32>,
    %c0_203 = arith.constant 0 : index
    %c64_204 = arith.constant 64 : index
    %319 = vector.load %arg4[%c0_203, %c64_204] : memref<32x192xf32, #tpu.memory_space<vmem>>, vector<16x32xf32>
    tpu.vector_store %arg4[%c0_203, %c64_204], %310 {strides = array<i32>} : memref<32x192xf32, #tpu.memory_space<vmem>>, vector<16x32xf32>,
    %c0_205 = arith.constant 0 : index
    %c0_206 = arith.constant 0 : index
    %320 = vector.load %arg4[%c0_205, %c0_206] : memref<32x192xf32, #tpu.memory_space<vmem>>, vector<16x96xf32>
    %321 = arith.truncf %320 : vector<16x96xf32> to vector<16x96xbf16>
    %c1360 = arith.constant 1360 : index
    %c0_207 = arith.constant 0 : index
    %322 = vector.load %arg1[%c1360, %c0_207] : memref<1600x64xbf16, #tpu.memory_space<vmem>>, vector<96x16xbf16>
    %cst_208 = arith.constant dense<0.000000e+00> : vector<16x16xf32>
    %323 = tpu.matmul %321, %322, %cst_208 {dimension_numbers = #tpu.dot_dimension_numbers<[1], [0], [0], [1], [0, 0, 1, 1], [], []>} : vector<16x96xbf16>, vector<96x16xbf16>, vector<16x16xf32> -> vector<16x16xf32>
    %c17 = arith.constant 17 : index
    %c0_209 = arith.constant 0 : index
    %324 = vector.load %arg2[%c17, %c0_209] : memref<24x64xf32, #tpu.memory_space<vmem>>, vector<1x16xf32>
    %325 = vector.broadcast %324 : vector<1x16xf32> to vector<16x16xf32>
    %326 = arith.addf %323, %325 : vector<16x16xf32>
    %cst_210 = arith.constant 0.000000e+00 : f32
    %327 = vector.broadcast %cst_210 : f32 to vector<16x16xf32>
    %328 = arith.maximumf %326, %327 : vector<16x16xf32>
    %cst_211 = arith.constant 0.000000e+00 : f32
    %329 = vector.broadcast %cst_211 : f32 to vector<16x16xf32>
    %c0_212 = arith.constant 0 : index
    %c0_213 = arith.constant 0 : index
    %330 = vector.load %arg4[%c0_212, %c0_213] : memref<32x192xf32, #tpu.memory_space<vmem>>, vector<16x16xf32>
    tpu.vector_store %arg4[%c0_212, %c0_213], %329 {strides = array<i32>} : memref<32x192xf32, #tpu.memory_space<vmem>>, vector<16x16xf32>,
    %c4_i32_214 = arith.constant 4 : i32
    %331 = tpu.dynamic_rotate %328 by %c4_i32_214 dim 0 : vector<16x16xf32>, i32 -> vector<16x16xf32>
    %cst_215 = arith.constant 0.000000e+00 : f32
    %332 = vector.broadcast %cst_215 : f32 to vector<16x16xf32>
    %333 = vector.shape_cast %257 : vector<16x1xi1> to vector<16x1xi1>
    %334 = vector.broadcast %333 : vector<16x1xi1> to vector<16x16xi1>
    %335 = arith.select %334, %331, %332 : vector<16x16xi1>, vector<16x16xf32>
    %c0_216 = arith.constant 0 : index
    %c16_217 = arith.constant 16 : index
    %336 = vector.load %arg4[%c0_216, %c16_217] : memref<32x192xf32, #tpu.memory_space<vmem>>, vector<16x16xf32>
    tpu.vector_store %arg4[%c0_216, %c16_217], %335 {strides = array<i32>} : memref<32x192xf32, #tpu.memory_space<vmem>>, vector<16x16xf32>,
    %c0_218 = arith.constant 0 : index
    %c32_219 = arith.constant 32 : index
    %337 = vector.load %arg4[%c0_218, %c32_219] : memref<32x192xf32, #tpu.memory_space<vmem>>, vector<16x16xf32>
    tpu.vector_store %arg4[%c0_218, %c32_219], %328 {strides = array<i32>} : memref<32x192xf32, #tpu.memory_space<vmem>>, vector<16x16xf32>,
    %c0_220 = arith.constant 0 : index
    %c0_221 = arith.constant 0 : index
    %338 = vector.load %arg4[%c0_220, %c0_221] : memref<32x192xf32, #tpu.memory_space<vmem>>, vector<16x48xf32>
    %339 = arith.truncf %338 : vector<16x48xf32> to vector<16x48xbf16>
    %c1456 = arith.constant 1456 : index
    %c0_222 = arith.constant 0 : index
    %340 = vector.load %arg1[%c1456, %c0_222] : memref<1600x64xbf16, #tpu.memory_space<vmem>>, vector<48x16xbf16>
    %cst_223 = arith.constant dense<0.000000e+00> : vector<16x16xf32>
    %341 = tpu.matmul %339, %340, %cst_223 {dimension_numbers = #tpu.dot_dimension_numbers<[1], [0], [0], [1], [0, 0, 1, 1], [], []>} : vector<16x48xbf16>, vector<48x16xbf16>, vector<16x16xf32> -> vector<16x16xf32>
    %c18 = arith.constant 18 : index
    %c0_224 = arith.constant 0 : index
    %342 = vector.load %arg2[%c18, %c0_224] : memref<24x64xf32, #tpu.memory_space<vmem>>, vector<1x16xf32>
    %343 = vector.broadcast %342 : vector<1x16xf32> to vector<16x16xf32>
    %344 = arith.addf %341, %343 : vector<16x16xf32>
    %cst_225 = arith.constant 0.000000e+00 : f32
    %345 = vector.broadcast %cst_225 : f32 to vector<16x16xf32>
    %346 = arith.maximumf %344, %345 : vector<16x16xf32>
    %c1504 = arith.constant 1504 : index
    %c0_226 = arith.constant 0 : index
    %347 = vector.load %arg1[%c1504, %c0_226] : memref<1600x64xbf16, #tpu.memory_space<vmem>>, vector<32x16xbf16>
    %348 = arith.truncf %310 : vector<16x32xf32> to vector<16x32xbf16>
    %cst_227 = arith.constant dense<0.000000e+00> : vector<16x16xf32>
    %349 = tpu.matmul %348, %347, %cst_227 {dimension_numbers = #tpu.dot_dimension_numbers<[1], [0], [0], [1], [0, 0, 1, 1], [], []>} : vector<16x32xbf16>, vector<32x16xbf16>, vector<16x16xf32> -> vector<16x16xf32>
    %c19 = arith.constant 19 : index
    %c0_228 = arith.constant 0 : index
    %350 = vector.load %arg2[%c19, %c0_228] : memref<24x64xf32, #tpu.memory_space<vmem>>, vector<1x16xf32>
    %351 = vector.broadcast %350 : vector<1x16xf32> to vector<16x16xf32>
    %352 = arith.addf %349, %351 : vector<16x16xf32>
    %353 = arith.addf %346, %352 : vector<16x16xf32>
    %cst_229 = arith.constant 0.000000e+00 : f32
    %354 = vector.broadcast %cst_229 : f32 to vector<16x16xf32>
    %355 = arith.maximumf %353, %354 : vector<16x16xf32>
    %c20 = arith.constant 20 : index
    %c0_230 = arith.constant 0 : index
    %356 = vector.load %arg2[%c20, %c0_230] : memref<24x64xf32, #tpu.memory_space<vmem>>, vector<1x16xf32>
    %357 = vector.broadcast %356 : vector<1x16xf32> to vector<16x16xf32>
    %358 = arith.mulf %355, %357 : vector<16x16xf32>
    %c21 = arith.constant 21 : index
    %c0_231 = arith.constant 0 : index
    %359 = vector.load %arg2[%c21, %c0_231] : memref<24x64xf32, #tpu.memory_space<vmem>>, vector<1x16xf32>
    %360 = vector.broadcast %359 : vector<1x16xf32> to vector<16x16xf32>
    %361 = arith.addf %358, %360 : vector<16x16xf32>
    %c0_232 = arith.constant 0 : index
    %c0_233 = arith.constant 0 : index
    %362 = vector.load %arg5[%c0_232, %c0_233] : memref<32x16xf32, #tpu.memory_space<vmem>>, vector<16x16xf32>
    tpu.vector_store %arg5[%c0_232, %c0_233], %361 {strides = array<i32>} : memref<32x16xf32, #tpu.memory_space<vmem>>, vector<16x16xf32>,
    %c0_234 = arith.constant 0 : index
    %c0_235 = arith.constant 0 : index
    %363 = tpu.strided_load %arg5[%c0_234, %c0_235] {strides = array<i32: 2, 1>} : memref<32x16xf32, #tpu.memory_space<vmem>>, vector<8x16xf32>
    %c1_236 = arith.constant 1 : index
    %c0_237 = arith.constant 0 : index
    %364 = tpu.strided_load %arg5[%c1_236, %c0_237] {strides = array<i32: 2, 1>} : memref<32x16xf32, #tpu.memory_space<vmem>>, vector<8x16xf32>
    %365 = arith.maximumf %363, %364 : vector<8x16xf32>
    %c0_238 = arith.constant 0 : index
    %c0_239 = arith.constant 0 : index
    %366 = vector.load %arg5[%c0_238, %c0_239] : memref<32x16xf32, #tpu.memory_space<vmem>>, vector<8x16xf32>
    tpu.vector_store %arg5[%c0_238, %c0_239], %365 {strides = array<i32>} : memref<32x16xf32, #tpu.memory_space<vmem>>, vector<8x16xf32>,
    %c0_240 = arith.constant 0 : index
    %c0_241 = arith.constant 0 : index
    %367 = tpu.strided_load %arg5[%c0_240, %c0_241] {strides = array<i32: 4, 1>} : memref<32x16xf32, #tpu.memory_space<vmem>>, vector<2x16xf32>
    %c0_242 = arith.constant 0 : index
    %c0_243 = arith.constant 0 : index
    %368 = vector.load %arg6[%c0_242, %c0_243] : memref<2x64xf32, #tpu.memory_space<vmem>>, vector<2x16xf32>
    tpu.vector_store %arg6[%c0_242, %c0_243], %367 {strides = array<i32>} : memref<2x64xf32, #tpu.memory_space<vmem>>, vector<2x16xf32>,
    %c1_244 = arith.constant 1 : index
    %c0_245 = arith.constant 0 : index
    %369 = tpu.strided_load %arg5[%c1_244, %c0_245] {strides = array<i32: 4, 1>} : memref<32x16xf32, #tpu.memory_space<vmem>>, vector<2x16xf32>
    %c0_246 = arith.constant 0 : index
    %c16_247 = arith.constant 16 : index
    %370 = vector.load %arg6[%c0_246, %c16_247] : memref<2x64xf32, #tpu.memory_space<vmem>>, vector<2x16xf32>
    tpu.vector_store %arg6[%c0_246, %c16_247], %369 {strides = array<i32>} : memref<2x64xf32, #tpu.memory_space<vmem>>, vector<2x16xf32>,
    %c2_248 = arith.constant 2 : index
    %c0_249 = arith.constant 0 : index
    %371 = tpu.strided_load %arg5[%c2_248, %c0_249] {strides = array<i32: 4, 1>} : memref<32x16xf32, #tpu.memory_space<vmem>>, vector<2x16xf32>
    %c0_250 = arith.constant 0 : index
    %c32_251 = arith.constant 32 : index
    %372 = vector.load %arg6[%c0_250, %c32_251] : memref<2x64xf32, #tpu.memory_space<vmem>>, vector<2x16xf32>
    tpu.vector_store %arg6[%c0_250, %c32_251], %371 {strides = array<i32>} : memref<2x64xf32, #tpu.memory_space<vmem>>, vector<2x16xf32>,
    %c3_252 = arith.constant 3 : index
    %c0_253 = arith.constant 0 : index
    %373 = tpu.strided_load %arg5[%c3_252, %c0_253] {strides = array<i32: 4, 1>} : memref<32x16xf32, #tpu.memory_space<vmem>>, vector<2x16xf32>
    %c0_254 = arith.constant 0 : index
    %c48 = arith.constant 48 : index
    %374 = vector.load %arg6[%c0_254, %c48] : memref<2x64xf32, #tpu.memory_space<vmem>>, vector<2x16xf32>
    tpu.vector_store %arg6[%c0_254, %c48], %373 {strides = array<i32>} : memref<2x64xf32, #tpu.memory_space<vmem>>, vector<2x16xf32>,
    %c1536 = arith.constant 1536 : index
    %c0_255 = arith.constant 0 : index
    %375 = vector.load %arg1[%c1536, %c0_255] : memref<1600x64xbf16, #tpu.memory_space<vmem>>, vector<64x20xbf16>
    %c0_256 = arith.constant 0 : index
    %c0_257 = arith.constant 0 : index
    %376 = vector.load %arg6[%c0_256, %c0_257] : memref<2x64xf32, #tpu.memory_space<vmem>>, vector<2x64xf32>
    %377 = arith.truncf %376 : vector<2x64xf32> to vector<2x64xbf16>
    %cst_258 = arith.constant dense<0.000000e+00> : vector<2x20xf32>
    %378 = tpu.matmul %377, %375, %cst_258 {dimension_numbers = #tpu.dot_dimension_numbers<[1], [0], [0], [1], [0, 0, 1, 1], [], []>} : vector<2x64xbf16>, vector<64x20xbf16>, vector<2x20xf32> -> vector<2x20xf32>
    %c22 = arith.constant 22 : index
    %c0_259 = arith.constant 0 : index
    %379 = vector.load %arg2[%c22, %c0_259] : memref<24x64xf32, #tpu.memory_space<vmem>>, vector<1x20xf32>
    %380 = vector.broadcast %379 : vector<1x20xf32> to vector<2x20xf32>
    %381 = arith.addf %378, %380 : vector<2x20xf32>
    %c0_260 = arith.constant 0 : index
    %c0_261 = arith.constant 0 : index
    %382 = vector.load %arg3[%c0_260, %c0_261] : memref<2x20xf32, #tpu.memory_space<vmem>>, vector<2x20xf32>
    tpu.vector_store %arg3[%c0_260, %c0_261], %381 {strides = array<i32>} : memref<2x20xf32, #tpu.memory_space<vmem>>, vector<2x20xf32>,
    return
  }
}

</mosaic_0001>

<bundles_post_ra>
// kernel: _forward_impl.1
= control target key start
LH: loop header
LB: loop body
LE: loop exit
PB: predicated region body
PF: predicated region fallthrough
CT: control target
= control target key end

     0   :  { %v19_v0 = vlaneseq  ;;  %s2726_s16 = smov 8   ;;  %vm53_vm5 = vcmask 31744   ;;  %vm147_vm7 = vcmask 1045504   ;;  %vm99_vm8 = vcmask 64544   ;;  %s2728_s14 = smov 64   ;;  %s3592_s0 = inlined_call_operand.vmem [shape: f32[32,4], index: 0, kind: input, shape index: {}]   ;;  %s3593_s2 = inlined_call_operand.vmem [shape: f32[24,64], index: 2, kind: input, shape index: {}]   ;;  %s3594_s1 = inlined_call_operand.vmem [shape: bf16[1600,64], index: 1, kind: input, shape index: {}]   ;;  %s3595_s3 = inlined_call_operand.vmem [shape: f32[2,20], index: 3, kind: output, shape index: {}]  }
   0x1   :  { %v2756_v1 = vld [vmem:[%s3592_s0] sm:$0xff]  ;;  %v2761_v2 = vld [vmem:[%s3592_s0 + $0x18] sm:$0xff]  ;;  %v2771_v6 = vld [vmem:[%s3592_s0 + $0x8] sm:$0xff]  ;;  %vm120_vm9 = vcmask 97344   ;;  %vm140_vm10 = vcmask 97280   ;;  %vm186_vm11 = vcmask 523264  }
   0x2   :  { %v2763_v3 = vshrl.u32 %v19_v0, 7  ;;  %v62_v4 = vrot.slane %v2756_v1, 7  ;;  %v65_v5 = vrot.slane %v2761_v2, 7  ;;  %108 = vrot.lane.b32.xlu1 %v2756_v1, %s2726_s16  ;;  %v2776_v7 = vld [vmem:[%s3592_s0 + $0x10] sm:$0xff]  ;;  %v63_v11 = vrot.slane %v2771_v6, 7  ;;  %s2727_s0 = smov 4  }
   0x3   :  { %v64_v8 = vrot.slane %v2776_v7, 7  ;;  %v35_v19 = vrot.slane %v2761_v2, 6  ;;  %v32_v20 = vrot.slane %v2756_v1, 6  ;;  %v33_v23 = vrot.slane %v2771_v6, 6  ;;  %v2175_v27 = vld [vmem:[%s3594_s1] sm:$0xf] }
   0x4   :  { %v2780_v9 = vand.u32 15, %v2763_v3  ;;  %vm66_vm0 = vcmp.lt.s32.totalorder %v2763_v3, 1  ;;  %v22_v12 = vadd.s32 16, %v2763_v3  ;;  %vm36_vm3 = vcmp.lt.s32.totalorder %v2763_v3, 2  ;;  %v2597_v28 = vld [vmem:[%s3594_s1] sm:$0x30] }
   0x5   :  { %v70_v10 = vsel %vm66_vm0, %v65_v5, %v62_v4  ;;  %v68_v15 = vsel %vm66_vm0, %v63_v11, %v64_v8  ;;  %v69_v17 = vsel %vm66_vm0, %v62_v4, %v63_v11  ;;  %v67_v18 = vsel %vm66_vm0, %v64_v8, %v65_v5  ;;  %v2609_v47 = vld [vmem:[%s3594_s1 + $0x60] sm:$0xff]  ;;  %v2608_v48 = vld [vmem:[%s3594_s1 + $0x58] sm:$0xff]  ;;  %v2607_v49 = vld [vmem:[%s3594_s1 + $0x50] sm:$0xff]  ;;  %s2729_s10 = smov 32   ;;  %s2731_s20 = smov 16  }
   0x6   :  { %vm58_vm1 = vcmp.ge.s32.totalorder %v2780_v9, 1  ;;  %v2790_v14 = vand.u32 15, %v22_v12  ;;  %vm28_vm4 = vcmp.ge.s32.totalorder %v2780_v9, 2  ;;  %v40_v21 = vsel %vm36_vm3, %v35_v19, %v32_v20  ;;  %367 = vmatpush.bf16.msra.mxu2 %v2609_v47  ;;  %v2606_v50 = vld [vmem:[%s3594_s1 + $0x48] sm:$0xff]  ;;  %v2703_v51 = vld [vmem:[%s3593_s2] ss:$0 sm:$0xff] }
   0x7   :  { %v79_v13 = vsel %vm58_vm1, %v70_v10, 0.0  ;;  %v49_v22 = vsel %vm28_vm4, %v40_v21, 0.0  ;;  %v34_v24 = vrot.slane %v2776_v7, 6  ;;  %v39_v25 = vsel %vm36_vm3, %v32_v20, %v33_v23  ;;  %v2605_v57 = vld [vmem:[%s3594_s1 + $0x40] sm:$0xff]  ;;  %v2604_v59 = vld [vmem:[%s3594_s1 + $0x38] sm:$0xff]  ;;  %v2603_v4 = vld [vmem:[%s3594_s1 + $0x30] sm:$0xff] }
   0x8   :  { %87 = vrot.lane.b32.xlu0 %v79_v13, %s2727_s0  ;;  %vm60_vm2 = vcmp.ge.s32.totalorder %v2790_v14, 1  ;;  %54 = vst.msk [vmem:[#allocation2] sm:$0xff] %vm53_vm5, %v49_v22  ;;  %vm30_vm6 = vcmp.ge.s32.totalorder %v2790_v14, 2  ;;  %v2176_v31 = vor.u32 %v2597_v28, %v2175_v27  ;;  %344 = vmatpush.bf16.msra.mxu1 %v2605_v57  ;;  %v2602_v12 = vld [vmem:[%s3594_s1 + $0x28] sm:$0xff]  ;;  %vm397_vm12 = vcmask 1041408   ;;  %v2619_v57 = vld [vmem:[%s3594_s1 + $0xb8] sm:$0xff] }
   0x9   :  { %v81_v16 = vsel %vm60_vm2, %v68_v15, 0.0  ;;  %55 = vst.msk [vmem:[#allocation2 + $0x10] sm:$0xff] %vm53_vm5, %v39_v25  ;;  %v38_v26 = vsel %vm36_vm3, %v33_v23, %v34_v24  ;;  %v37_v33 = vsel %vm36_vm3, %v34_v24, %v35_v19  ;;  %vm219_vm13 = vcmask 1048064   ;;  %s2732_s28 = smov 48  }
   0xa   :  { %110 = vrot.lane.b32.xlu1 %v2771_v6, %s2726_s16  ;;  %91 = vrot.lane.b32.xlu2 %v81_v16, %s2727_s0  ;;  %v51_v30 = vsel %vm30_vm6, %v38_v26, 0.0  ;;  %v149_v32 = vsel %vm147_vm7, %v2176_v31, 0  ;;  %57 = vst.msk [vmem:[#allocation2 + $0x30] sm:$0xff] %vm53_vm5, %v37_v33  ;;  %vm436_vm14 = vcmp.lt.s32.totalorder %v2763_v3, 4  ;;  %vm430_vm15 = vcmp.ge.s32.totalorder %v2790_v14, 4  ;;  %v2639_v14 = vld [vmem:[%s3594_s1 + $0x158] sm:$0xff] }
   0xb   :  { %56 = vst.msk [vmem:[#allocation2 + $0x20] sm:$0xff] %vm53_vm5, %v51_v30  ;;  %158 = vmatpush.bf16.msra.mxu0 %v149_v32  ;;  %368 = vmatpush.bf16.msra.mxu2 %v2608_v48  ;;  %vm1038_vm7 = vcmask 130048  }
   0xc   :  { %345 = vmatpush.bf16.msra.mxu1 %v2604_v59 }
   0xf   :  { %369 = vmatpush.bf16.msra.mxu2 %v2607_v49 }
  0x10   :  { %89 = vrot.lane.b32.xlu0 %v69_v17, %s2727_s0  ;;  %346 = vmatpush.bf16.msra.mxu1 %v2603_v4 }
  0x12   :  { %114 = vrot.lane.b32.xlu1 %v2761_v2, %s2726_s16  ;;  %93 = vrot.lane.b32.xlu2 %v67_v18, %s2727_s0 }
  0x13   :  { %370 = vmatpush.bf16.msra.mxu2 %v2606_v50 }
  0x14   :  { %347 = vmatpush.bf16.msra.mxu1 %v2602_v12 }
  0x18   :  { %112 = vrot.lane.b32.xlu0 %v2776_v7, %s2726_s16 }
  0x64   :  { %v92_v29 = vpop.permute.xlu2 %91 }
  0x65   :  { %102 = vst.msk [vmem:[#allocation2 + $0x20] sm:$0xff] %vm99_vm8, %v92_v29 }
  0x6c   :  { %v94_v34 = vpop.permute.xlu2 %93 }
  0x6d   :  { %103 = vst.msk [vmem:[#allocation2 + $0x30] sm:$0xff] %vm99_vm8, %v94_v34 }
  0x74   :  { %v109_v35 = vpop.permute.xlu1 %108 }
  0x7a   :  { %v88_v36 = vpop.permute.xlu0 %87 }
  0x7b   :  { %100 = vst.msk [vmem:[#allocation2] sm:$0xff] %vm99_vm8, %v88_v36 }
  0x7c   :  { %121 = vst.msk [vmem:[#allocation2] sm:$0xff] %vm120_vm9, %v109_v35  ;;  %v111_v37 = vpop.permute.xlu1 %110 }
  0x82   :  { %v90_v38 = vpop.permute.xlu0 %89 }
  0x83   :  { %101 = vst.msk [vmem:[#allocation2 + $0x10] sm:$0xff] %vm99_vm8, %v90_v38  ;;  %v125_v41 = vld [vmem:[#allocation2] sm:$0xff]  ;;  %v386_v38 = vld [vmem:[%s3594_s1 + $0x68] sm:$0x3]  ;;  %vm1071_vm8 = vcmask 261248  }
  0x84   :  { %122 = vst.msk [vmem:[#allocation2 + $0x10] sm:$0xff] %vm120_vm9, %v111_v37  ;;  %v115_v39 = vpop.permute.xlu1 %114  ;;  %v2601_v37 = vld [vmem:[%s3594_s1 + $0x20] sm:$0xff] }
  0x85   :  { %124 = vst.msk [vmem:[#allocation2 + $0x30] sm:$0xff] %vm120_vm9, %v115_v39  ;;  %v399_v39 = vsel %vm397_vm12, %v386_v38, 0  ;;  %348 = vmatpush.bf16.msra.mxu1 %v2601_v37 }
  0x86   :  { %408 = vmatpush.bf16.msra.mxu3 %v399_v39 }
  0x8a   :  { %v113_v40 = vpop.permute.xlu0 %112 }
  0x8b   :  { %v126_v42 = vld [vmem:[#allocation2 + $0x10] sm:$0xff]  ;;  %123 = vst.msk [vmem:[#allocation2 + $0x20] sm:$0xff] %vm120_vm9, %v113_v40  ;;  %v2600_v40 = vld [vmem:[%s3594_s1 + $0x18] sm:$0xff]  ;;  %vm1092_vm9 = vcmask 392448  }
  0x8c   :  { %v129_v43 = vpack.c.bf16 %v126_v42, %v125_v41  ;;  %v128_v45 = vld [vmem:[#allocation2 + $0x30] sm:$0xff]  ;;  %v387_v41 = vpack.c.bf16 %v2771_v6, %v2756_v1  ;;  %349 = vmatpush.bf16.msra.mxu1 %v2600_v40 }
  0x8d   :  { %v2599_v42 = vld [vmem:[%s3594_s1 + $0x10] sm:$0xff] }
  0x8e   :  { %2177 = vmatmul.msk.bf16.vlgmr.msra.gmra.mxu0 %vm140_vm10, %v129_v43  ;;  %2229 = vmatmul.msk.bf16.vlgmr.msra.gmra.mxu3 %vm53_vm5, %v387_v41  ;;  %v2598_v43 = vld [vmem:[%s3594_s1 + $0x8] sm:$0xff] }
  0x90   :  { %350 = vmatpush.bf16.msra.mxu1 %v2599_v42 }
  0x92   :  { %v127_v44 = vld [vmem:[#allocation2 + $0x20] sm:$0xff] }
  0x93   :  { %v130_v46 = vpack.c.bf16 %v128_v45, %v127_v44  ;;  %v388_v44 = vpack.c.bf16 %v2761_v2, %v2776_v7 }
  0x94   :  { %351 = vmatpush.bf16.msra.mxu1 %v2598_v43 }
  0x9e   :  { %2178 = vmatmul.msk.bf16.gmra.mxu0 %vm140_vm10, %v130_v46  ;;  %2230 = vmatmul.msk.bf16.gmra.mxu3 %vm53_vm5, %v388_v44  ;;  %vm717_vm5 = vcmask 785920   ;;  %vm1129_vm10 = vcmask 392192  }
 0x10b   :  { %v160_v52 = vpop.f32.mrf.mxu0 }
 0x10c   :  { %v161_v53 = vadd.f32 %v2703_v51, %v160_v52  ;;  %v2630_v52 = vld [vmem:[%s3594_s1 + $0x110] sm:$0xff] }
 0x10e   :  { %v170_v54 = vmax.f32 %v161_v53, 0.0  ;;  %v2621_v53 = vld [vmem:[%s3594_s1 + $0xc8] sm:$0xff] }
 0x10f   :  { %632 = vmatpush.bf16.msrb.mxu3 %v2621_v53 }
 0x110   :  { %224 = vst.msk [vmem:[#allocation2 + $0x8] sm:$0xff] %vm186_vm11, %v170_v54  ;;  %v174_v60 = vrot.slane %v170_v54, 6  ;;  %v191_v61 = vrot.slane %v170_v54, 7  ;;  %v2629_v54 = vld [vmem:[%s3594_s1 + $0x108] sm:$0xff] }
 0x113   :  { %v162_v55 = vpop.f32.mrf.mxu0 }
 0x114   :  { %v163_v56 = vadd.f32 %v2703_v51, %v162_v55  ;;  %v2620_v55 = vld [vmem:[%s3594_s1 + $0xc0] sm:$0xff] }
 0x115   :  { %633 = vmatpush.bf16.msrb.mxu3 %v2620_v55 }
 0x116   :  { %v171_v58 = vmax.f32 %v163_v56, 0.0  ;;  %v2628_v56 = vld [vmem:[%s3594_s1 + $0x100] sm:$0xff] }
 0x117   :  { %v229_v13 = vld [vmem:[#allocation2 + $0x8] sm:$0xff] }
 0x118   :  { %v175_v62 = vrot.slane %v171_v58, 6  ;;  %v192_v63 = vrot.slane %v171_v58, 7  ;;  %225 = vst.msk [vmem:[#allocation2 + $0x18] sm:$0xff] %vm186_vm11, %v171_v58  ;;  %v2618_v58 = vld [vmem:[%s3594_s1 + $0xb0] sm:$0xff] }
 0x119   :  { %634 = vmatpush.bf16.msrb.mxu3 %v2619_v57 }
 0x11a   :  { %v197_v0 = vsel %vm66_vm0, %v191_v61, %v192_v63  ;;  %v180_v5 = vsel %vm36_vm3, %v174_v60, %v175_v62 }
 0x11b   :  { %v165_v8 = vpop.f32.mrf.mxu0  ;;  %209 = vrot.lane.b32.xlu0 %v197_v0, %s2728_s14  ;;  %188 = vst.msk [vmem:[#allocation2 + $0x10] sm:$0xff] %vm186_vm11, %v180_v5 }
 0x11c   :  { %v166_v10 = vadd.f32 %v2703_v51, %v165_v8 }
 0x11d   :  { %635 = vmatpush.bf16.msrb.mxu3 %v2618_v58 }
 0x11e   :  { %v172_v11 = vmax.f32 %v166_v10, 0.0 }
 0x11f   :  { %v231_v15 = vld [vmem:[#allocation2 + $0x18] sm:$0xff] }
 0x120   :  { %v176_v16 = vrot.slane %v172_v11, 6  ;;  %v193_v17 = vrot.slane %v172_v11, 7  ;;  %226 = vst.msk [vmem:[#allocation2 + $0x28] sm:$0xff] %vm186_vm11, %v172_v11  ;;  %v237_v18 = vpack.c.bf16 %v231_v15, %v229_v13 }
 0x122   :  { %2227 = vmatmul.msk.bf16.vlgmr.msra.gmra.mxu2 %vm186_vm11, %v237_v18  ;;  %v196_v19 = vsel %vm66_vm0, %v192_v63, %v193_v17  ;;  %v179_v20 = vsel %vm36_vm3, %v175_v62, %v176_v16  ;;  %v2704_v62 = vld [vmem:[%s3593_s2 + $0x2] ss:$0 sm:$0xff] }
 0x123   :  { %v167_v21 = vpop.f32.mrf.mxu0  ;;  %v201_v22 = vsel %vm60_vm2, %v196_v19, 0.0  ;;  %v184_v23 = vsel %vm30_vm6, %v179_v20, 0.0  ;;  %vm663_vm2 = vcmask 261120  }
 0x124   :  { %v168_v24 = vadd.f32 %v2703_v51, %v167_v21  ;;  %211 = vrot.lane.b32.xlu1 %v201_v22, %s2728_s14  ;;  %189 = vst.msk [vmem:[#allocation2 + $0x20] sm:$0xff] %vm186_vm11, %v184_v23  ;;  %v2631_v51 = vld [vmem:[%s3594_s1 + $0x118] sm:$0xff] }
 0x125   :  { %854 = vmatpush.bf16.msrb.mxu1 %v2631_v51 }
 0x126   :  { %v173_v25 = vmax.f32 %v168_v24, 0.0 }
 0x127   :  { %v233_v33 = vld [vmem:[#allocation2 + $0x28] sm:$0xff] }
 0x128   :  { %v177_v26 = vrot.slane %v173_v25, 6  ;;  %v194_v27 = vrot.slane %v173_v25, 7  ;;  %227 = vst.msk [vmem:[#allocation2 + $0x38] sm:$0xff] %vm186_vm11, %v173_v25 }
 0x129   :  { %855 = vmatpush.bf16.msrb.mxu1 %v2630_v52 }
 0x12a   :  { %v198_v28 = vsel %vm66_vm0, %v194_v27, %v191_v61  ;;  %v181_v29 = vsel %vm36_vm3, %v177_v26, %v174_v60  ;;  %v178_v30 = vsel %vm36_vm3, %v176_v16, %v177_v26  ;;  %v195_v36 = vsel %vm66_vm0, %v193_v17, %v194_v27  ;;  %v410_v60 = vpop.f32.mrf.mxu3  ;;  %v2705_v61 = vld [vmem:[%s3593_s2 + $0x1] ss:$0 sm:$0xff] }
 0x12b   :  { %v199_v31 = vsel %vm58_vm1, %v198_v28, 0.0  ;;  %v182_v32 = vsel %vm28_vm4, %v181_v29, 0.0  ;;  %190 = vst.msk [vmem:[#allocation2 + $0x30] sm:$0xff] %vm186_vm11, %v178_v30  ;;  %v411_v4 = vadd.f32 %v2704_v62, %v410_v60  ;;  %vm428_vm1 = vcmp.ge.s32.totalorder %v2780_v9, 4 }
 0x12c   :  { %207 = vrot.lane.b32.xlu2 %v199_v31, %s2728_s14  ;;  %187 = vst.msk [vmem:[#allocation2] sm:$0xff] %vm186_vm11, %v182_v32 }
 0x12d   :  { %856 = vmatpush.bf16.msrb.mxu1 %v2629_v54 }
 0x12f   :  { %v235_v34 = vld [vmem:[#allocation2 + $0x38] sm:$0xff] }
 0x130   :  { %v239_v35 = vpack.c.bf16 %v235_v34, %v233_v33 }
 0x131   :  { %857 = vmatpush.bf16.msrb.mxu1 %v2628_v56 }
 0x132   :  { %2228 = vmatmul.msk.bf16.gmra.mxu2 %vm186_vm11, %v239_v35  ;;  %v412_v11 = vpop.f32.mrf.mxu3 }
 0x133   :  { %v413_v18 = vadd.f32 %v2704_v62, %v412_v11  ;;  %v2612_v11 = vld [vmem:[%s3594_s1 + $0x80] sm:$0xff] }
 0x134   :  { %213 = vrot.lane.b32.xlu2 %v195_v36, %s2728_s14 }
 0x13a   :  { %v415_v22 = vpop.f32.mrf.mxu3 }
 0x13b   :  { %v416_v26 = vadd.f32 %v2704_v62, %v415_v22 }
 0x142   :  { %v417_v41 = vpop.f32.mrf.mxu3 }
 0x186   :  { %v208_v1 = vpop.permute.xlu2 %207 }
 0x187   :  { %220 = vst.msk [vmem:[#allocation2] sm:$0xff] %vm219_vm13, %v208_v1 }
 0x18d   :  { %v210_v6 = vpop.permute.xlu0 %209 }
 0x18e   :  { %221 = vst.msk [vmem:[#allocation2 + $0x10] sm:$0xff] %vm219_vm13, %v210_v6  ;;  %v214_v45 = vpop.permute.xlu2 %213  ;;  %v228_v46 = vld [vmem:[#allocation2] sm:$0xff] }
 0x18f   :  { %223 = vst.msk [vmem:[#allocation2 + $0x30] sm:$0xff] %vm219_vm13, %v214_v45 }
 0x195   :  { %v230_v47 = vld [vmem:[#allocation2 + $0x10] sm:$0xff] }
 0x196   :  { %v212_v48 = vpop.permute.xlu1 %211  ;;  %v236_v49 = vpack.c.bf16 %v230_v47, %v228_v46  ;;  %v234_v7 = vld [vmem:[#allocation2 + $0x30] sm:$0xff]  ;;  %v418_v46 = vadd.f32 %v2704_v62, %v417_v41 }
 0x197   :  { %222 = vst.msk [vmem:[#allocation2 + $0x20] sm:$0xff] %vm219_vm13, %v212_v48 }
 0x198   :  { %352 = vmatmul.bf16.vlgmr.msra.gmra.mxu1 %v236_v49 }
 0x19e   :  { %v232_v2 = vld [vmem:[#allocation2 + $0x20] sm:$0xff] }
 0x19f   :  { %v238_v50 = vpack.c.bf16 %v234_v7, %v232_v2 }
 0x1a5   :  { %v372_v59 = vpop.f32.mrf.mxu2 }
 0x1a8   :  { %357 = vmatmul.bf16.gmra.mxu1 %v238_v50 }
 0x1ad   :  { %v374_v8 = vpop.f32.mrf.mxu2 }
 0x1b5   :  { %v377_v20 = vpop.f32.mrf.mxu2 }
 0x1bd   :  { %v379_v40 = vpop.f32.mrf.mxu2 }
 0x215   :  { %v353_v63 = vpop.f32.mrf.mxu1 }
 0x216   :  { %v354_v0 = vadd.f32 %v2705_v61, %v353_v63 }
 0x218   :  { %v373_v5 = vadd.f32 %v372_v59, %v354_v0  ;;  %v2617_v0 = vld [vmem:[%s3594_s1 + $0xa8] sm:$0xff] }
 0x219   :  { %609 = vmatpush.bf16.msrb.mxu0 %v2617_v0  ;;  %v2625_v0 = vld [vmem:[%s3594_s1 + $0xe8] sm:$0xff] }
 0x21a   :  { %v382_v10 = vmax.f32 %v373_v5, 0.0  ;;  %v2615_v5 = vld [vmem:[%s3594_s1 + $0x98] sm:$0xff] }
 0x21c   :  { %v420_v12 = vadd.f32 %v411_v4, %v382_v10  ;;  %v2616_v4 = vld [vmem:[%s3594_s1 + $0xa0] sm:$0xff]  ;;  %v2613_v10 = vld [vmem:[%s3594_s1 + $0x88] sm:$0xff] }
 0x21d   :  { %v355_v13 = vpop.f32.mrf.mxu1  ;;  %610 = vmatpush.bf16.msrb.mxu0 %v2616_v4 }
 0x21e   :  { %v424_v15 = vmax.f32 %v420_v12, 0.0  ;;  %v356_v16 = vadd.f32 %v2705_v61, %v355_v13  ;;  %v2611_v13 = vld [vmem:[%s3594_s1 + $0x78] sm:$0xff] }
 0x220   :  { %489 = vst.msk [vmem:[#allocation2 + $0x8] sm:$0xff] %vm186_vm11, %v424_v15  ;;  %v375_v17 = vadd.f32 %v374_v8, %v356_v16  ;;  %v457_v27 = vrot.slane %v424_v15, 6  ;;  %v432_v28 = vrot.slane %v424_v15, 4  ;;  %v2614_v8 = vld [vmem:[%s3594_s1 + $0x90] sm:$0xff] }
 0x221   :  { %611 = vmatpush.bf16.msrb.mxu0 %v2615_v5 }
 0x222   :  { %v383_v19 = vmax.f32 %v375_v17, 0.0 }
 0x224   :  { %v421_v21 = vadd.f32 %v413_v18, %v383_v19 }
 0x225   :  { %v358_v23 = vpop.f32.mrf.mxu1  ;;  %612 = vmatpush.bf16.msrb.mxu0 %v2614_v8  ;;  %v2624_v8 = vld [vmem:[%s3594_s1 + $0xe0] sm:$0xff] }
 0x226   :  { %v425_v24 = vmax.f32 %v421_v21, 0.0  ;;  %v359_v25 = vadd.f32 %v2705_v61, %v358_v23 }
 0x227   :  { %v494_v42 = vld [vmem:[#allocation2 + $0x8] sm:$0xff] }
 0x228   :  { %490 = vst.msk [vmem:[#allocation2 + $0x18] sm:$0xff] %vm186_vm11, %v425_v24  ;;  %v378_v29 = vadd.f32 %v377_v20, %v359_v25  ;;  %v816_v30 = vpack.c.bf16 %v425_v24, %v424_v15  ;;  %v458_v31 = vrot.slane %v425_v24, 6  ;;  %v433_v32 = vrot.slane %v425_v24, 4  ;;  %v2610_v15 = vld [vmem:[%s3594_s1 + $0x70] sm:$0xff] }
 0x229   :  { %613 = vmatpush.bf16.msrb.mxu0 %v2613_v10  ;;  %v2623_v10 = vld [vmem:[%s3594_s1 + $0xd8] sm:$0xff] }
 0x22a   :  { %v384_v33 = vmax.f32 %v378_v29, 0.0  ;;  %2323 = vmatmul.msk.bf16.vlgmr.msrb.gmra.mxu1 %vm186_vm11, %v816_v30  ;;  %v463_v34 = vsel %vm36_vm3, %v457_v27, %v458_v31  ;;  %v439_v35 = vsel %vm436_vm14, %v432_v28, %v433_v32 }
 0x22b   :  { %475 = vrot.lane.b32.xlu1 %v463_v34, %s2728_s14  ;;  %454 = vst.msk [vmem:[#allocation2 + $0x10] sm:$0xff] %vm186_vm11, %v439_v35 }
 0x22c   :  { %v422_v36 = vadd.f32 %v416_v26, %v384_v33  ;;  %v2707_v26 = vld [vmem:[%s3593_s2 + $0x3] ss:$0 sm:$0xff] }
 0x22d   :  { %v360_v37 = vpop.f32.mrf.mxu1  ;;  %614 = vmatpush.bf16.msrb.mxu0 %v2612_v11  ;;  %v2622_v11 = vld [vmem:[%s3594_s1 + $0xd0] sm:$0xff] }
 0x22e   :  { %v426_v38 = vmax.f32 %v422_v36, 0.0  ;;  %v361_v39 = vadd.f32 %v2705_v61, %v360_v37 }
 0x22f   :  { %v496_v43 = vld [vmem:[#allocation2 + $0x18] sm:$0xff] }
 0x230   :  { %491 = vst.msk [vmem:[#allocation2 + $0x28] sm:$0xff] %vm186_vm11, %v426_v38  ;;  %v380_v44 = vadd.f32 %v379_v40, %v361_v39  ;;  %v502_v1 = vpack.c.bf16 %v496_v43, %v494_v42  ;;  %v459_v6 = vrot.slane %v426_v38, 6  ;;  %v434_v45 = vrot.slane %v426_v38, 4 }
 0x231   :  { %615 = vmatpush.bf16.msrb.mxu0 %v2611_v13 }
 0x232   :  { %v385_v47 = vmax.f32 %v380_v44, 0.0  ;;  %2279 = vmatmul.msk.bf16.vlgmr.msrb.gmra.mxu3 %vm186_vm11, %v502_v1  ;;  %v462_v48 = vsel %vm36_vm3, %v458_v31, %v459_v6  ;;  %v438_v49 = vsel %vm436_vm14, %v433_v32, %v434_v45 }
 0x233   :  { %v467_v2 = vsel %vm30_vm6, %v462_v48, 0.0  ;;  %v451_v7 = vsel %vm430_vm15, %v438_v49, 0.0 }
 0x234   :  { %v423_v50 = vadd.f32 %v418_v46, %v385_v47  ;;  %477 = vrot.lane.b32.xlu2 %v467_v2, %s2728_s14  ;;  %455 = vst.msk [vmem:[#allocation2 + $0x20] sm:$0xff] %vm186_vm11, %v451_v7 }
 0x235   :  { %616 = vmatpush.bf16.msrb.mxu0 %v2610_v15 }
 0x236   :  { %v427_v51 = vmax.f32 %v423_v50, 0.0 }
 0x237   :  { %v498_v60 = vld [vmem:[#allocation2 + $0x28] sm:$0xff] }
 0x238   :  { %492 = vst.msk [vmem:[#allocation2 + $0x38] sm:$0xff] %vm186_vm11, %v427_v51  ;;  %v817_v52 = vpack.c.bf16 %v427_v51, %v426_v38  ;;  %v460_v53 = vrot.slane %v427_v51, 6  ;;  %v435_v54 = vrot.slane %v427_v51, 4 }
 0x23a   :  { %2324 = vmatmul.msk.bf16.gmra.mxu1 %vm186_vm11, %v817_v52  ;;  %v464_v55 = vsel %vm36_vm3, %v460_v53, %v457_v27  ;;  %v440_v56 = vsel %vm436_vm14, %v435_v54, %v432_v28  ;;  %v437_v57 = vsel %vm436_vm14, %v434_v45, %v435_v54  ;;  %v461_v63 = vsel %vm36_vm3, %v459_v6, %v460_v53 }
 0x23b   :  { %v465_v58 = vsel %vm28_vm4, %v464_v55, 0.0  ;;  %v449_v59 = vsel %vm428_vm1, %v440_v56, 0.0  ;;  %456 = vst.msk [vmem:[#allocation2 + $0x30] sm:$0xff] %vm186_vm11, %v437_v57 }
 0x23c   :  { %473 = vrot.lane.b32.xlu0 %v465_v58, %s2728_s14  ;;  %453 = vst.msk [vmem:[#allocation2] sm:$0xff] %vm186_vm11, %v449_v59 }
 0x23f   :  { %v500_v61 = vld [vmem:[#allocation2 + $0x38] sm:$0xff] }
 0x240   :  { %v504_v62 = vpack.c.bf16 %v500_v61, %v498_v60 }
 0x242   :  { %2280 = vmatmul.msk.bf16.gmra.mxu3 %vm186_vm11, %v504_v62  ;;  %v2627_v62 = vld [vmem:[%s3594_s1 + $0xf8] sm:$0xff] }
 0x243   :  { %787 = vmatpush.bf16.msrb.mxu2 %v2627_v62 }
 0x244   :  { %479 = vrot.lane.b32.xlu0 %v461_v63, %s2728_s14  ;;  %v2626_v63 = vld [vmem:[%s3594_s1 + $0xf0] sm:$0xff] }
 0x247   :  { %788 = vmatpush.bf16.msrb.mxu2 %v2626_v63 }
 0x24b   :  { %789 = vmatpush.bf16.msrb.mxu2 %v2625_v0 }
 0x24f   :  { %790 = vmatpush.bf16.msrb.mxu2 %v2624_v8  ;;  %v2636_v8 = vld [vmem:[%s3594_s1 + $0x140] sm:$0xff] }
 0x253   :  { %791 = vmatpush.bf16.msrb.mxu2 %v2623_v10  ;;  %v2635_v10 = vld [vmem:[%s3594_s1 + $0x138] sm:$0xff] }
 0x257   :  { %792 = vmatpush.bf16.msrb.mxu2 %v2622_v11 }
 0x28e   :  { %v478_v12 = vpop.permute.xlu2 %477 }
 0x28f   :  { %487 = vst.msk [vmem:[#allocation2 + $0x20] sm:$0xff] %vm219_vm13, %v478_v12 }
 0x296   :  { %v497_v23 = vld [vmem:[#allocation2 + $0x20] sm:$0xff] }
 0x29d   :  { %v476_v16 = vpop.permute.xlu1 %475 }
 0x29e   :  { %486 = vst.msk [vmem:[#allocation2 + $0x10] sm:$0xff] %vm219_vm13, %v476_v16 }
 0x2a5   :  { %v495_v20 = vld [vmem:[#allocation2 + $0x10] sm:$0xff] }
 0x2ae   :  { %v474_v17 = vpop.permute.xlu0 %473 }
 0x2af   :  { %485 = vst.msk [vmem:[#allocation2] sm:$0xff] %vm219_vm13, %v474_v17 }
 0x2b5   :  { %v637_v25 = vpop.f32.mrf.mxu3 }
 0x2b6   :  { %v480_v18 = vpop.permute.xlu0 %479  ;;  %v493_v19 = vld [vmem:[#allocation2] sm:$0xff] }
 0x2b7   :  { %488 = vst.msk [vmem:[#allocation2 + $0x30] sm:$0xff] %vm219_vm13, %v480_v18  ;;  %v501_v21 = vpack.c.bf16 %v495_v20, %v493_v19 }
 0x2b9   :  { %617 = vmatmul.bf16.vlgmr.msrb.gmra.mxu0 %v501_v21 }
 0x2bd   :  { %v639_v31 = vpop.f32.mrf.mxu3 }
 0x2be   :  { %v499_v22 = vld [vmem:[#allocation2 + $0x30] sm:$0xff] }
 0x2bf   :  { %v503_v24 = vpack.c.bf16 %v499_v22, %v497_v23 }
 0x2c5   :  { %v642_v40 = vpop.f32.mrf.mxu3 }
 0x2c9   :  { %622 = vmatmul.bf16.gmra.mxu0 %v503_v24 }
 0x2cd   :  { %v644_v7 = vpop.f32.mrf.mxu3 }
 0x336   :  { %v618_v27 = vpop.f32.mrf.mxu0 }
 0x337   :  { %v619_v28 = vadd.f32 %v2707_v26, %v618_v27  ;;  %v859_v27 = vpop.f32.mrf.mxu1 }
 0x339   :  { %v638_v29 = vadd.f32 %v637_v25, %v619_v28  ;;  %v2642_v25 = vld [vmem:[%s3594_s1 + $0x170] sm:$0xff]  ;;  %v2708_v28 = vld [vmem:[%s3593_s2 + $0x4] ss:$0 sm:$0xff] }
 0x33a   :  { %1191 = vmatpush.bf16.msra.mxu2 %v2642_v25 }
 0x33b   :  { %v647_v30 = vmax.f32 %v638_v29, 0.0  ;;  %v2706_v29 = vld [vmem:[%s3593_s2 + $0x5] ss:$0 sm:$0xff] }
 0x33d   :  { %705 = vrot.lane.b32.xlu0 %v647_v30, %s2728_s14  ;;  %v651_v36 = vrot.slane %v647_v30, 4  ;;  %v668_v38 = vrot.slane %v647_v30, 6 }
 0x33e   :  { %v620_v32 = vpop.f32.mrf.mxu0 }
 0x33f   :  { %v621_v33 = vadd.f32 %v2707_v26, %v620_v32  ;;  %v860_v32 = vadd.f32 %v2706_v29, %v859_v27 }
 0x341   :  { %v640_v34 = vadd.f32 %v639_v31, %v621_v33 }
 0x343   :  { %v648_v35 = vmax.f32 %v640_v34, 0.0  ;;  %v861_v34 = vpop.f32.mrf.mxu1 }
 0x345   :  { %v652_v37 = vrot.slane %v648_v35, 4  ;;  %v669_v39 = vrot.slane %v648_v35, 6 }
 0x346   :  { %v623_v41 = vpop.f32.mrf.mxu0 }
 0x347   :  { %v624_v42 = vadd.f32 %v2707_v26, %v623_v41  ;;  %v674_v43 = vsel %vm36_vm3, %v668_v38, %v669_v39  ;;  %v657_v44 = vsel %vm436_vm14, %v651_v36, %v652_v37 }
 0x348   :  { %686 = vrot.lane.b32.xlu2 %v674_v43, %s2729_s10  ;;  %665 = vst.msk [vmem:[#allocation2 + $0x10] sm:$0xff] %vm663_vm2, %v657_v44 }
 0x349   :  { %v643_v1 = vadd.f32 %v642_v40, %v624_v42 }
 0x34b   :  { %v649_v6 = vmax.f32 %v643_v1, 0.0  ;;  %v864_v42 = vpop.f32.mrf.mxu1 }
 0x34d   :  { %v653_v45 = vrot.slane %v649_v6, 4  ;;  %v670_v46 = vrot.slane %v649_v6, 6 }
 0x34e   :  { %v625_v47 = vpop.f32.mrf.mxu0 }
 0x34f   :  { %v626_v48 = vadd.f32 %v2707_v26, %v625_v47  ;;  %v673_v49 = vsel %vm36_vm3, %v669_v39, %v670_v46  ;;  %v656_v2 = vsel %vm436_vm14, %v652_v37, %v653_v45  ;;  %v2641_v26 = vld [vmem:[%s3594_s1 + $0x168] sm:$0xff]  ;;  %v862_v39 = vadd.f32 %v2706_v29, %v861_v34 }
 0x350   :  { %v678_v50 = vsel %vm30_vm6, %v673_v49, 0.0  ;;  %v661_v51 = vsel %vm430_vm15, %v656_v2, 0.0  ;;  %vm3596_vm6 = vcmask 785408   ;;  %1192 = vmatpush.bf16.msra.mxu2 %v2641_v26  ;;  %v865_v47 = vadd.f32 %v2706_v29, %v864_v42 }
 0x351   :  { %v645_v52 = vadd.f32 %v644_v7, %v626_v48  ;;  %688 = vrot.lane.b32.xlu2 %v678_v50, %s2729_s10  ;;  %666 = vst.msk [vmem:[#allocation2 + $0x20] sm:$0xff] %vm663_vm2, %v661_v51 }
 0x353   :  { %v650_v53 = vmax.f32 %v645_v52, 0.0  ;;  %v866_v50 = vpop.f32.mrf.mxu1 }
 0x355   :  { %v654_v54 = vrot.slane %v650_v53, 4  ;;  %v671_v55 = vrot.slane %v650_v53, 6 }
 0x357   :  { %v672_v56 = vsel %vm36_vm3, %v670_v46, %v671_v55  ;;  %v675_v57 = vsel %vm36_vm3, %v671_v55, %v668_v38  ;;  %v655_v58 = vsel %vm436_vm14, %v653_v45, %v654_v54  ;;  %v658_v59 = vsel %vm436_vm14, %v654_v54, %v651_v36 }
 0x358   :  { %690 = vrot.lane.b32.xlu0 %v672_v56, %s2729_s10  ;;  %v676_v60 = vsel %vm28_vm4, %v675_v57, 0.0  ;;  %667 = vst.msk [vmem:[#allocation2 + $0x30] sm:$0xff] %vm663_vm2, %v655_v58  ;;  %v659_v61 = vsel %vm428_vm1, %v658_v59, 0.0  ;;  %vm696_vm4 = vcmask 523520   ;;  %v867_v54 = vadd.f32 %v2706_v29, %v866_v50  ;;  %v2710_v29 = vld [vmem:[%s3593_s2 + $0x6] ss:$0 sm:$0xff] }
 0x359   :  { %684 = vrot.lane.b32.xlu1 %v676_v60, %s2729_s10  ;;  %711 = vrot.lane.b32.xlu2 %v650_v53, %s2728_s14  ;;  %664 = vst.msk [vmem:[#allocation2] sm:$0xff] %vm663_vm2, %v659_v61 }
 0x361   :  { %707 = vrot.lane.b32.xlu1 %v648_v35, %s2728_s14 }
 0x369   :  { %709 = vrot.lane.b32.xlu1 %v649_v6, %s2728_s14 }
 0x3a2   :  { %v687_v4 = vpop.permute.xlu2 %686 }
 0x3a3   :  { %698 = vst.msk [vmem:[#allocation2 + $0x10] sm:$0xff] %vm696_vm4, %v687_v4  ;;  %v2637_v4 = vld [vmem:[%s3594_s1 + $0x148] sm:$0xff] }
 0x3a4   :  { %1013 = vmatpush.bf16.msra.mxu0 %v2637_v4  ;;  %v2709_v4 = vld [vmem:[%s3593_s2 + $0x8] ss:$0 sm:$0xff] }
 0x3a8   :  { %1014 = vmatpush.bf16.msra.mxu0 %v2636_v8 }
 0x3ab   :  { %v689_v5 = vpop.permute.xlu2 %688 }
 0x3ac   :  { %699 = vst.msk [vmem:[#allocation2 + $0x20] sm:$0xff] %vm696_vm4, %v689_v5  ;;  %v2730_v5 = vmov 0.0   ;;  %1015 = vmatpush.bf16.msra.mxu0 %v2635_v10 }
 0x3af   :  { %v706_v12 = vpop.permute.xlu0 %705 }
 0x3b3   :  { %v712_v15 = vpop.permute.xlu2 %711 }
 0x3ca   :  { %v691_v13 = vpop.permute.xlu0 %690 }
 0x3cb   :  { %700 = vst.msk [vmem:[#allocation2 + $0x30] sm:$0xff] %vm696_vm4, %v691_v13  ;;  %v685_v16 = vpop.permute.xlu1 %684 }
 0x3cc   :  { %721 = vst.msk [vmem:[#allocation2 + $0x30] sm:$0xff] %vm717_vm5, %v712_v15  ;;  %v2633_v15 = vld [vmem:[%s3594_s1 + $0x128] sm:$0xff] }
 0x3cd   :  { %697 = vst.msk [vmem:[#allocation2] sm:$0xff] %vm696_vm4, %v685_v16  ;;  %v2632_v16 = vld [vmem:[%s3594_s1 + $0x120] sm:$0xff] }
 0x3ce   :  { %718 = vst.msk [vmem:[#allocation2] sm:$0xff] %vm717_vm5, %v706_v12  ;;  %v2634_v12 = vld [vmem:[%s3594_s1 + $0x130] sm:$0xff] }
 0x3cf   :  { %1016 = vmatpush.bf16.msra.mxu0 %v2634_v12 }
 0x3d3   :  { %v708_v17 = vpop.permute.xlu1 %707  ;;  %v725_v23 = vld [vmem:[#allocation2 + $0x30] sm:$0xff]  ;;  %1017 = vmatpush.bf16.msra.mxu0 %v2633_v15 }
 0x3d4   :  { %719 = vst.msk [vmem:[#allocation2 + $0x10] sm:$0xff] %vm717_vm5, %v708_v17 }
 0x3d5   :  { %v722_v19 = vld [vmem:[#allocation2] sm:$0xff] }
 0x3d6   :  { %893 = vst.msk [vmem:[#allocation2] sm:$0xff] %vm663_vm2, %v2730_v5 }
 0x3d7   :  { %1018 = vmatpush.bf16.msra.mxu0 %v2632_v16  ;;  %v2712_v16 = vld [vmem:[%s3593_s2 + $0x9] ss:$0 sm:$0xff] }
 0x3db   :  { %v710_v18 = vpop.permute.xlu1 %709  ;;  %v723_v20 = vld [vmem:[#allocation2 + $0x10] sm:$0xff] }
 0x3dc   :  { %720 = vst.msk [vmem:[#allocation2 + $0x20] sm:$0xff] %vm717_vm5, %v710_v18  ;;  %v726_v21 = vpack.c.bf16 %v723_v20, %v722_v19 }
 0x3de   :  { %2305 = vmatmul.msk.bf16.vlgmr.msrb.gmra.mxu2 %vm3596_vm6, %v726_v21 }
 0x3e3   :  { %v724_v22 = vld [vmem:[#allocation2 + $0x20] sm:$0xff] }
 0x3e4   :  { %v727_v24 = vpack.c.bf16 %v725_v23, %v724_v22  ;;  %895 = vst.msk [vmem:[#allocation2 + $0x20] sm:$0xff] %vm663_vm2, %v2730_v5 }
 0x3ee   :  { %2306 = vmatmul.msk.bf16.gmra.mxu2 %vm3596_vm6, %v727_v24 }
 0x461   :  { %v794_v30 = vpop.f32.mrf.mxu2 }
 0x462   :  { %v795_v31 = vadd.f32 %v2708_v28, %v794_v30 }
 0x464   :  { %v804_v33 = vmax.f32 %v795_v31, 0.0 }
 0x466   :  { %v869_v35 = vadd.f32 %v860_v32, %v804_v33 }
 0x468   :  { %v873_v36 = vmax.f32 %v869_v35, 0.0 }
 0x469   :  { %v796_v37 = vpop.f32.mrf.mxu2 }
 0x46a   :  { %894 = vst.msk [vmem:[#allocation2 + $0x10] sm:$0xff] %vm663_vm2, %v873_v36  ;;  %v797_v38 = vadd.f32 %v2708_v28, %v796_v37  ;;  %933 = vrot.lane.b32.xlu2 %v873_v36, %s2728_s14  ;;  %v897_v45 = vrot.slane %v873_v36, 4 }
 0x46c   :  { %v805_v40 = vmax.f32 %v797_v38, 0.0 }
 0x46e   :  { %v870_v41 = vadd.f32 %v862_v39, %v805_v40 }
 0x470   :  { %v874_v43 = vmax.f32 %v870_v41, 0.0  ;;  %v2640_v41 = vld [vmem:[%s3594_s1 + $0x160] sm:$0xff] }
 0x471   :  { %v799_v44 = vpop.f32.mrf.mxu2  ;;  %1141 = vmatpush.bf16.msra.mxu3 %v2640_v41 }
 0x472   :  { %v1163_v1 = vpack.c.bf16 %v874_v43, %v873_v36  ;;  %v800_v6 = vadd.f32 %v2708_v28, %v799_v44  ;;  %v898_v46 = vrot.slane %v874_v43, 4 }
 0x474   :  { %v806_v48 = vmax.f32 %v800_v6, 0.0  ;;  %2373 = vmatmul.msk.bf16.vlgmr.msra.gmra.mxu2 %vm663_vm2, %v1163_v1  ;;  %v903_v49 = vsel %vm436_vm14, %v897_v45, %v898_v46 }
 0x475   :  { %915 = vrot.lane.b32.xlu1 %v903_v49, %s2729_s10  ;;  %1142 = vmatpush.bf16.msra.mxu3 %v2639_v14 }
 0x476   :  { %v871_v2 = vadd.f32 %v865_v47, %v806_v48 }
 0x478   :  { %v875_v7 = vmax.f32 %v871_v2, 0.0 }
 0x479   :  { %v801_v51 = vpop.f32.mrf.mxu2 }
 0x47a   :  { %896 = vst.msk [vmem:[#allocation2 + $0x30] sm:$0xff] %vm663_vm2, %v875_v7  ;;  %v802_v52 = vadd.f32 %v2708_v28, %v801_v51  ;;  %v899_v53 = vrot.slane %v875_v7, 4 }
 0x47c   :  { %v807_v55 = vmax.f32 %v802_v52, 0.0  ;;  %v902_v56 = vsel %vm436_vm14, %v898_v46, %v899_v53 }
 0x47d   :  { %v907_v57 = vsel %vm430_vm15, %v902_v56, 0.0 }
 0x47e   :  { %v872_v58 = vadd.f32 %v867_v54, %v807_v55  ;;  %917 = vrot.lane.b32.xlu1 %v907_v57, %s2729_s10 }
 0x480   :  { %v876_v59 = vmax.f32 %v872_v58, 0.0 }
 0x482   :  { %v1164_v60 = vpack.c.bf16 %v876_v59, %v875_v7  ;;  %v900_v61 = vrot.slane %v876_v59, 4 }
 0x484   :  { %2374 = vmatmul.msk.bf16.gmra.mxu2 %vm663_vm2, %v1164_v60  ;;  %v901_v62 = vsel %vm436_vm14, %v899_v53, %v900_v61  ;;  %v904_v63 = vsel %vm436_vm14, %v900_v61, %v897_v45 }
 0x485   :  { %919 = vrot.lane.b32.xlu2 %v901_v62, %s2729_s10  ;;  %v905_v0 = vsel %vm428_vm1, %v904_v63, 0.0 }
 0x486   :  { %913 = vrot.lane.b32.xlu0 %v905_v0, %s2729_s10  ;;  %939 = vrot.lane.b32.xlu1 %v876_v59, %s2728_s14  ;;  %v2711_v0 = vld [vmem:[%s3593_s2 + $0x7] ss:$0 sm:$0xff] }
 0x48e   :  { %935 = vrot.lane.b32.xlu0 %v874_v43, %s2728_s14 }
 0x496   :  { %937 = vrot.lane.b32.xlu0 %v875_v7, %s2728_s14  ;;  %v2638_v7 = vld [vmem:[%s3594_s1 + $0x150] sm:$0xff] }
 0x497   :  { %1143 = vmatpush.bf16.msra.mxu3 %v2638_v7 }
 0x4c4   :  { %v934_v11 = vpop.permute.xlu2 %933 }
 0x4df   :  { %v920_v13 = vpop.permute.xlu2 %919 }
 0x4e0   :  { %928 = vst.msk [vmem:[#allocation2 + $0x30] sm:$0xff] %vm696_vm4, %v920_v13 }
 0x4e7   :  { %v916_v17 = vpop.permute.xlu1 %915 }
 0x4e8   :  { %926 = vst.msk [vmem:[#allocation2 + $0x10] sm:$0xff] %vm696_vm4, %v916_v17 }
 0x4f0   :  { %v918_v18 = vpop.permute.xlu1 %917 }
 0x4f1   :  { %927 = vst.msk [vmem:[#allocation2 + $0x20] sm:$0xff] %vm696_vm4, %v918_v18  ;;  %v2713_v18 = vld [vmem:[%s3593_s2 + $0xa] ss:$0 sm:$0xff] }
 0x4f7   :  { %v1194_v63 = vpop.f32.mrf.mxu2 }
 0x4f8   :  { %v914_v19 = vpop.permute.xlu0 %913  ;;  %v940_v20 = vpop.permute.xlu1 %939 }
 0x4f9   :  { %925 = vst.msk [vmem:[#allocation2] sm:$0xff] %vm696_vm4, %v914_v19 }
 0x4fa   :  { %945 = vst.msk [vmem:[#allocation2] sm:$0xff] %vm717_vm5, %v934_v11  ;;  %v1195_v11 = vadd.f32 %v2709_v4, %v1194_v63  ;;  %v2645_v63 = vld [vmem:[%s3594_s1 + $0x188] sm:$0xff] }
 0x4fb   :  { %948 = vst.msk [vmem:[#allocation2 + $0x30] sm:$0xff] %vm717_vm5, %v940_v20  ;;  %1322 = vmatpush.bf16.msra.mxu1 %v2645_v63 }
 0x4ff   :  { %v1196_v13 = vpop.f32.mrf.mxu2 }
 0x500   :  { %v936_v21 = vpop.permute.xlu0 %935 }
 0x501   :  { %946 = vst.msk [vmem:[#allocation2 + $0x10] sm:$0xff] %vm717_vm5, %v936_v21  ;;  %v949_v23 = vld [vmem:[#allocation2] sm:$0xff] }
 0x502   :  { %v952_v27 = vld [vmem:[#allocation2 + $0x30] sm:$0xff]  ;;  %1039 = vst.msk [vmem:[#allocation2] sm:$0xff] %vm1038_vm7, %v2730_v5 }
 0x508   :  { %v938_v22 = vpop.permute.xlu0 %937  ;;  %v950_v24 = vld [vmem:[#allocation2 + $0x10] sm:$0xff] }
 0x509   :  { %947 = vst.msk [vmem:[#allocation2 + $0x20] sm:$0xff] %vm717_vm5, %v938_v22  ;;  %v953_v25 = vpack.c.bf16 %v950_v24, %v949_v23  ;;  %v1197_v22 = vadd.f32 %v2709_v4, %v1196_v13 }
 0x50b   :  { %2349 = vmatmul.msk.bf16.vlgmr.msra.gmra.mxu0 %vm3596_vm6, %v953_v25 }
 0x510   :  { %v951_v26 = vld [vmem:[#allocation2 + $0x20] sm:$0xff] }
 0x511   :  { %v954_v28 = vpack.c.bf16 %v952_v27, %v951_v26  ;;  %1041 = vst.msk [vmem:[#allocation2 + $0x20] sm:$0xff] %vm1038_vm7, %v2730_v5  ;;  %v1199_v26 = vpop.f32.mrf.mxu2 }
 0x51b   :  { %2350 = vmatmul.msk.bf16.gmra.mxu0 %vm3596_vm6, %v954_v28 }
 0x588   :  { %v1020_v30 = vpop.f32.mrf.mxu0 }
 0x589   :  { %v1021_v31 = vadd.f32 %v2710_v29, %v1020_v30 }
 0x58b   :  { %v1030_v32 = vmax.f32 %v1021_v31, 0.0  ;;  %v1200_v31 = vadd.f32 %v2709_v4, %v1199_v26 }
 0x58d   :  { %1080 = vrot.lane.b32.xlu1 %v1030_v32, %s2729_s10  ;;  %1040 = vst.msk [vmem:[#allocation2 + $0x10] sm:$0xff] %vm1038_vm7, %v1030_v32  ;;  %v1043_v36 = vrot.slane %v1030_v32, 4 }
 0x590   :  { %v1022_v33 = vpop.f32.mrf.mxu0 }
 0x591   :  { %v1023_v34 = vadd.f32 %v2710_v29, %v1022_v33 }
 0x593   :  { %v1031_v35 = vmax.f32 %v1023_v34, 0.0 }
 0x595   :  { %v1044_v37 = vrot.slane %v1031_v35, 4 }
 0x597   :  { %v1049_v38 = vsel %vm436_vm14, %v1043_v36, %v1044_v37 }
 0x598   :  { %v1025_v39 = vpop.f32.mrf.mxu0  ;;  %1061 = vrot.lane.b32.xlu0 %v1049_v38, %s2731_s20 }
 0x599   :  { %v1026_v40 = vadd.f32 %v2710_v29, %v1025_v39 }
 0x59b   :  { %v1032_v42 = vmax.f32 %v1026_v40, 0.0 }
 0x59d   :  { %v1045_v43 = vrot.slane %v1032_v42, 4  ;;  %1042 = vst.msk [vmem:[#allocation2 + $0x30] sm:$0xff] %vm1038_vm7, %v1032_v42 }
 0x59f   :  { %v1048_v44 = vsel %vm436_vm14, %v1044_v37, %v1045_v43 }
 0x5a0   :  { %v1027_v1 = vpop.f32.mrf.mxu0  ;;  %v1053_v6 = vsel %vm430_vm15, %v1048_v44, 0.0 }
 0x5a1   :  { %v1028_v45 = vadd.f32 %v2710_v29, %v1027_v1  ;;  %1063 = vrot.lane.b32.xlu0 %v1053_v6, %s2731_s20 }
 0x5a3   :  { %v1033_v46 = vmax.f32 %v1028_v45, 0.0 }
 0x5a5   :  { %v1046_v47 = vrot.slane %v1033_v46, 4 }
 0x5a7   :  { %v1047_v48 = vsel %vm436_vm14, %v1045_v43, %v1046_v47  ;;  %v1050_v49 = vsel %vm436_vm14, %v1046_v47, %v1043_v36  ;;  %v1201_v36 = vpop.f32.mrf.mxu2 }
 0x5a8   :  { %1065 = vrot.lane.b32.xlu1 %v1047_v48, %s2731_s20  ;;  %v1051_v2 = vsel %vm428_vm1, %v1050_v49, 0.0  ;;  %v1202_v40 = vadd.f32 %v2709_v4, %v1201_v36  ;;  %v21_v48 = vadd.s32 8, %v2763_v3  ;;  %v3230_v49 = vand.u32 7, %v2763_v3  ;;  %v2688_v3 = vld [vmem:[%s3594_s1 + $0x2e0] sm:$0xff] }
 0x5a9   :  { %1059 = vrot.lane.b32.xlu2 %v1051_v2, %s2731_s20  ;;  %1086 = vrot.lane.b32.xlu0 %v1033_v46, %s2729_s10 }
 0x5aa   :  { %v3232_v2 = vand.u32 7, %v21_v48  ;;  %vm1239_vm12 = vcmp.ge.s32.totalorder %v3230_v49, 2  ;;  %vm1253_vm15 = vcmp.ge.s32.totalorder %v3230_v49, 1  ;;  %v2647_v48 = vld [vmem:[%s3594_s1 + $0x198] sm:$0xff] }
 0x5ac   :  { %vm1240_vm1 = vcmp.ge.s32.totalorder %v3232_v2, 2  ;;  %vm1254_vm6 = vcmp.ge.s32.totalorder %v3232_v2, 1 }
 0x5b1   :  { %1082 = vrot.lane.b32.xlu2 %v1031_v35, %s2729_s10 }
 0x5b9   :  { %1084 = vrot.lane.b32.xlu2 %v1032_v42, %s2729_s10 }
 0x5ff   :  { %v1081_v50 = vpop.permute.xlu1 %1080 }
 0x603   :  { %v1060_v9 = vpop.permute.xlu2 %1059 }
 0x604   :  { %1072 = vst.msk [vmem:[#allocation2] sm:$0xff] %vm1071_vm8, %v1060_v9 }
 0x605   :  { %1093 = vst.msk [vmem:[#allocation2] sm:$0xff] %vm1092_vm9, %v1081_v50 }
 0x60a   :  { %v1062_v51 = vpop.permute.xlu0 %1061 }
 0x60b   :  { %1073 = vst.msk [vmem:[#allocation2 + $0x10] sm:$0xff] %vm1071_vm8, %v1062_v51  ;;  %v1083_v52 = vpop.permute.xlu2 %1082 }
 0x60c   :  { %1094 = vst.msk [vmem:[#allocation2 + $0x10] sm:$0xff] %vm1092_vm9, %v1083_v52  ;;  %v1097_v55 = vld [vmem:[#allocation2] sm:$0xff] }
 0x613   :  { %v1085_v53 = vpop.permute.xlu2 %1084  ;;  %v1064_v54 = vpop.permute.xlu0 %1063  ;;  %v1098_v56 = vld [vmem:[#allocation2 + $0x10] sm:$0xff] }
 0x614   :  { %1074 = vst.msk [vmem:[#allocation2 + $0x20] sm:$0xff] %vm1071_vm8, %v1064_v54  ;;  %v1101_v57 = vpack.c.bf16 %v1098_v56, %v1097_v55 }
 0x615   :  { %1095 = vst.msk [vmem:[#allocation2 + $0x20] sm:$0xff] %vm1092_vm9, %v1085_v53 }
 0x616   :  { %2363 = vmatmul.msk.bf16.vlgmr.msra.gmra.mxu3 %vm1129_vm10, %v1101_v57 }
 0x61a   :  { %v1066_v58 = vpop.permute.xlu1 %1065 }
 0x61b   :  { %1075 = vst.msk [vmem:[#allocation2 + $0x30] sm:$0xff] %vm1071_vm8, %v1066_v58  ;;  %v1087_v59 = vpop.permute.xlu0 %1086 }
 0x61c   :  { %1096 = vst.msk [vmem:[#allocation2 + $0x30] sm:$0xff] %vm1092_vm9, %v1087_v59  ;;  %v1099_v60 = vld [vmem:[#allocation2 + $0x20] sm:$0xff] }
 0x623   :  { %v1100_v61 = vld [vmem:[#allocation2 + $0x30] sm:$0xff] }
 0x624   :  { %v1102_v62 = vpack.c.bf16 %v1100_v61, %v1099_v60 }
 0x626   :  { %2364 = vmatmul.msk.bf16.gmra.mxu3 %vm1129_vm10, %v1102_v62 }
 0x699   :  { %v1145_v8 = vpop.f32.mrf.mxu3 }
 0x69a   :  { %v1146_v10 = vadd.f32 %v2711_v0, %v1145_v8  ;;  %v2643_v8 = vld [vmem:[%s3594_s1 + $0x178] sm:$0xff] }
 0x69c   :  { %v1155_v12 = vmax.f32 %v1146_v10, 0.0  ;;  %v2658_v10 = vld [vmem:[%s3594_s1 + $0x1f0] sm:$0xff] }
 0x69e   :  { %v1204_v15 = vadd.f32 %v1195_v11, %v1155_v12 }
 0x6a0   :  { %v1208_v17 = vmax.f32 %v1204_v15, 0.0 }
 0x6a1   :  { %v1147_v19 = vpop.f32.mrf.mxu3 }
 0x6a2   :  { %v1214_v20 = vmul.f32 %v2712_v16, %v1208_v17  ;;  %v1148_v21 = vadd.f32 %v2711_v0, %v1147_v19  ;;  %v2656_v19 = vld [vmem:[%s3594_s1 + $0x1e0] sm:$0xff] }
 0x6a4   :  { %v1220_v23 = vadd.f32 %v2713_v18, %v1214_v20  ;;  %v1156_v24 = vmax.f32 %v1148_v21, 0.0  ;;  %v2655_v20 = vld [vmem:[%s3594_s1 + $0x1d8] sm:$0xff]  ;;  %v2654_v21 = vld [vmem:[%s3594_s1 + $0x1d0] sm:$0xff] }
 0x6a6   :  { %1224 = vst.msk [vmem:[#allocation3] sm:$0xff] %vm1038_vm7, %v1220_v23  ;;  %v1205_v25 = vadd.f32 %v1197_v22, %v1156_v24  ;;  %v2714_v22 = vld [vmem:[%s3593_s2 + $0xb] ss:$0 sm:$0xff] }
 0x6a8   :  { %v1209_v27 = vmax.f32 %v1205_v25, 0.0 }
 0x6a9   :  { %v1150_v28 = vpop.f32.mrf.mxu3 }
 0x6aa   :  { %v1215_v29 = vmul.f32 %v2712_v16, %v1209_v27  ;;  %v1151_v30 = vadd.f32 %v2711_v0, %v1150_v28 }
 0x6ac   :  { %v1221_v32 = vadd.f32 %v2713_v18, %v1215_v29  ;;  %v1157_v33 = vmax.f32 %v1151_v30, 0.0 }
 0x6ae   :  { %1225 = vst.msk [vmem:[#allocation3 + $0x8] sm:$0xff] %vm1038_vm7, %v1221_v32  ;;  %v1206_v34 = vadd.f32 %v1200_v31, %v1157_v33 }
 0x6b0   :  { %v1210_v35 = vmax.f32 %v1206_v34, 0.0 }
 0x6b1   :  { %v1152_v37 = vpop.f32.mrf.mxu3 }
 0x6b2   :  { %v1216_v38 = vmul.f32 %v2712_v16, %v1210_v35  ;;  %v1153_v39 = vadd.f32 %v2711_v0, %v1152_v37  ;;  %v2644_v0 = vld [vmem:[%s3594_s1 + $0x180] sm:$0xff] }
 0x6b3   :  { %1323 = vmatpush.bf16.msra.mxu1 %v2644_v0 }
 0x6b4   :  { %v1222_v41 = vadd.f32 %v2713_v18, %v1216_v38  ;;  %v1158_v42 = vmax.f32 %v1153_v39, 0.0 }
 0x6b5   :  { %v1228_v43 = vld [vmem:[#allocation3] ss:$2 sm:$0xff]  ;;  %v1232_v44 = vld [vmem:[#allocation3 + $0x1] ss:$2 sm:$0xff] }
 0x6b6   :  { %1226 = vst.msk [vmem:[#allocation3 + $0x10] sm:$0xff] %vm1038_vm7, %v1222_v41  ;;  %v1207_v1 = vadd.f32 %v1202_v40, %v1158_v42  ;;  %v1235_v6 = vmax.f32 %v1228_v43, %v1232_v44  ;;  %v2653_v44 = vld [vmem:[%s3594_s1 + $0x1c8] sm:$0xff] }
 0x6b7   :  { %1324 = vmatpush.bf16.msra.mxu1 %v2643_v8  ;;  %1466 = vmatpush.bf16.msrb.mxu0 %v2653_v44  ;;  %v2663_v44 = vld [vmem:[%s3594_s1 + $0x218] sm:$0xff] }
 0x6b8   :  { %v1211_v45 = vmax.f32 %v1207_v1, 0.0  ;;  %1277 = vrot.lane.b32.xlu0 %v1235_v6, %s2729_s10  ;;  %v1255_v50 = vrot.slane %v1235_v6, 7  ;;  %v1241_v53 = vrot.slane %v1235_v6, 6  ;;  %v2652_v1 = vld [vmem:[%s3594_s1 + $0x1c0] sm:$0xff] }
 0x6ba   :  { %v1217_v46 = vmul.f32 %v2712_v16, %v1211_v45  ;;  %v2650_v45 = vld [vmem:[%s3594_s1 + $0x1b0] sm:$0xff] }
 0x6bb   :  { %1517 = vmatpush.bf16.msrb.mxu1 %v2658_v10  ;;  %1467 = vmatpush.bf16.msrb.mxu0 %v2652_v1  ;;  %v2662_v1 = vld [vmem:[%s3594_s1 + $0x210] sm:$0xff] }
 0x6bc   :  { %v1223_v47 = vadd.f32 %v2713_v18, %v1217_v46  ;;  %v2657_v18 = vld [vmem:[%s3594_s1 + $0x1e8] sm:$0xff] }
 0x6bd   :  { %1484 = vmatpush.bf16.msrb.mxu3 %v2657_v18  ;;  %v2649_v46 = vld [vmem:[%s3594_s1 + $0x1a8] sm:$0xff] }
 0x6be   :  { %1227 = vst.msk [vmem:[#allocation3 + $0x18] sm:$0xff] %vm1038_vm7, %v1223_v47  ;;  %v2648_v47 = vld [vmem:[%s3594_s1 + $0x1a0] sm:$0xff] }
 0x6c1   :  { %1485 = vmatpush.bf16.msrb.mxu3 %v2656_v19 }
 0x6c5   :  { %v1230_v14 = vld [vmem:[#allocation3 + $0x10] ss:$2 sm:$0xff]  ;;  %v1234_v7 = vld [vmem:[#allocation3 + $0x11] ss:$2 sm:$0xff]  ;;  %1486 = vmatpush.bf16.msrb.mxu3 %v2655_v20 }
 0x6c6   :  { %v1236_v9 = vmax.f32 %v1230_v14, %v1234_v7  ;;  %v2646_v14 = vld [vmem:[%s3594_s1 + $0x190] sm:$0xff] }
 0x6c8   :  { %v1256_v51 = vrot.slane %v1236_v9, 7  ;;  %v1242_v52 = vrot.slane %v1236_v9, 6  ;;  %v1498_v54 = vpack.c.bf16 %v1236_v9, %v1235_v6  ;;  %v2651_v6 = vld [vmem:[%s3594_s1 + $0x1b8] sm:$0xff] }
 0x6c9   :  { %1487 = vmatpush.bf16.msrb.mxu3 %v2654_v21  ;;  %1468 = vmatpush.bf16.msrb.mxu0 %v2651_v6  ;;  %v2661_v6 = vld [vmem:[%s3594_s1 + $0x208] sm:$0xff] }
 0x6ca   :  { %v1258_v55 = vsel %vm66_vm0, %v1256_v51, %v1255_v50  ;;  %v1257_v56 = vsel %vm66_vm0, %v1255_v50, %v1256_v51  ;;  %v1243_v57 = vsel %vm36_vm3, %v1241_v53, %v1242_v52  ;;  %v1244_v58 = vsel %vm36_vm3, %v1242_v52, %v1241_v53  ;;  %v2680_v53 = vld [vmem:[%s3594_s1 + $0x2a0] sm:$0xff] }
 0x6cb   :  { %v1263_v59 = vsel %vm1253_vm15, %v1258_v55, 0.0  ;;  %v1264_v60 = vsel %vm1254_vm6, %v1257_v56, 0.0  ;;  %v1250_v61 = vsel %vm1240_vm1, %v1243_v57, 0.0  ;;  %v1249_v62 = vsel %vm1239_vm12, %v1244_v58, 0.0  ;;  %v2670_v55 = vld [vmem:[%s3594_s1 + $0x250] sm:$0xff]  ;;  %v2669_v57 = vld [vmem:[%s3594_s1 + $0x248] sm:$0xff] }
 0x6cc   :  { %1267 = vrot.lane.b32.xlu1 %v1263_v59, %s2731_s20  ;;  %1269 = vrot.lane.b32.xlu2 %v1264_v60, %s2731_s20  ;;  %1252 = vst.msk [vmem:[#allocation2 + $0x10] sm:$0xff] %vm1038_vm7, %v1250_v61  ;;  %v2678_v56 = vld [vmem:[%s3594_s1 + $0x290] sm:$0xff]  ;;  %v2677_v58 = vld [vmem:[%s3594_s1 + $0x288] sm:$0xff] }
 0x6cd   :  { %1251 = vst.msk [vmem:[#allocation2] sm:$0xff] %vm1038_vm7, %v1249_v62  ;;  %1469 = vmatpush.bf16.msrb.mxu0 %v2650_v45  ;;  %v2668_v59 = vld [vmem:[%s3594_s1 + $0x240] sm:$0xff]  ;;  %v2667_v60 = vld [vmem:[%s3594_s1 + $0x238] sm:$0xff]  ;;  %v2716_v61 = vld [vmem:[%s3593_s2 + $0xc] ss:$0 sm:$0xff] }
 0x6ce   :  { %v2660_v45 = vld [vmem:[%s3594_s1 + $0x200] sm:$0xff] }
 0x6d1   :  { %1470 = vmatpush.bf16.msrb.mxu0 %v2649_v46  ;;  %v2659_v46 = vld [vmem:[%s3594_s1 + $0x1f8] sm:$0xff] }
 0x6d4   :  { %1279 = vrot.lane.b32.xlu1 %v1236_v9, %s2729_s10 }
 0x6d5   :  { %1471 = vmatpush.bf16.msrb.mxu0 %v2648_v47 }
 0x6d9   :  { %1472 = vmatpush.bf16.msrb.mxu0 %v2647_v48 }
 0x6dd   :  { %1473 = vmatpush.bf16.msrb.mxu0 %v2646_v14 }
 0x6e1   :  { %1685 = vmatpush.bf16.msra.mxu0 %v2670_v55 }
 0x6e5   :  { %1686 = vmatpush.bf16.msra.mxu0 %v2669_v57 }
 0x6e9   :  { %1687 = vmatpush.bf16.msra.mxu0 %v2668_v59 }
 0x6ed   :  { %1688 = vmatpush.bf16.msra.mxu0 %v2667_v60 }
 0x726   :  { %v1270_v4 = vpop.permute.xlu2 %1269 }
 0x727   :  { %1274 = vst.msk [vmem:[#allocation2 + $0x10] sm:$0xff] %vm1071_vm8, %v1270_v4  ;;  %v2715_v4 = vld [vmem:[%s3593_s2 + $0xd] ss:$0 sm:$0xff] }
 0x72a   :  { %v1278_v12 = vpop.permute.xlu0 %1277 }
 0x73e   :  { %v1268_v11 = vpop.permute.xlu1 %1267 }
 0x73f   :  { %1273 = vst.msk [vmem:[#allocation2] sm:$0xff] %vm1071_vm8, %v1268_v11 }
 0x740   :  { %1283 = vst.msk [vmem:[#allocation2] sm:$0xff] %vm1092_vm9, %v1278_v12 }
 0x746   :  { %v1280_v13 = vpop.permute.xlu1 %1279 }
 0x747   :  { %1284 = vst.msk [vmem:[#allocation2 + $0x10] sm:$0xff] %vm1092_vm9, %v1280_v13  ;;  %v1285_v15 = vld [vmem:[#allocation2] sm:$0xff] }
 0x74e   :  { %v1286_v16 = vld [vmem:[#allocation2 + $0x10] sm:$0xff] }
 0x74f   :  { %v1287_v17 = vpack.c.bf16 %v1286_v16, %v1285_v15 }
 0x751   :  { %2387 = vmatmul.msk.bf16.vlgmr.msra.gmra.mxu1 %vm1129_vm10, %v1287_v17 }
 0x752   :  { %1845 = vmatpush.bf16.msra.mxu1 %v2680_v53 }
 0x761   :  { %2441 = vmatmul.msk.bf16.vlgmr.msrb.gmra.mxu1 %vm1038_vm7, %v1498_v54  ;;  %v2679_v54 = vld [vmem:[%s3594_s1 + $0x298] sm:$0xff] }
 0x762   :  { %1846 = vmatpush.bf16.msra.mxu1 %v2679_v54 }
 0x766   :  { %1847 = vmatpush.bf16.msra.mxu1 %v2678_v56 }
 0x76a   :  { %1848 = vmatpush.bf16.msra.mxu1 %v2677_v58 }
 0x7ce   :  { %v1326_v23 = vpop.f32.mrf.mxu1 }
 0x7cf   :  { %v1327_v24 = vadd.f32 %v2714_v22, %v1326_v23 }
 0x7d1   :  { %v1331_v25 = vmax.f32 %v1327_v24, 0.0 }
 0x7d3   :  { %1357 = vst.msk [vmem:[#allocation2 + $0x8] sm:$0xff] %vm186_vm11, %v1331_v25  ;;  %v1333_v29 = vrot.slane %v1331_v25, 6  ;;  %v1341_v30 = vrot.slane %v1331_v25, 7 }
 0x7d6   :  { %v1328_v26 = vpop.f32.mrf.mxu1 }
 0x7d7   :  { %v1329_v27 = vadd.f32 %v2714_v22, %v1328_v26 }
 0x7d9   :  { %v1332_v28 = vmax.f32 %v1329_v27, 0.0 }
 0x7da   :  { %v1360_v41 = vld [vmem:[#allocation2 + $0x8] sm:$0xff] }
 0x7db   :  { %v1334_v31 = vrot.slane %v1332_v28, 6  ;;  %v1342_v32 = vrot.slane %v1332_v28, 7  ;;  %1358 = vst.msk [vmem:[#allocation2 + $0x18] sm:$0xff] %vm186_vm11, %v1332_v28 }
 0x7dd   :  { %v1344_v33 = vsel %vm66_vm0, %v1342_v32, %v1341_v30  ;;  %v1343_v34 = vsel %vm66_vm0, %v1341_v30, %v1342_v32  ;;  %v1336_v35 = vsel %vm36_vm3, %v1334_v31, %v1333_v29  ;;  %v1335_v36 = vsel %vm36_vm3, %v1333_v29, %v1334_v31 }
 0x7de   :  { %v1345_v37 = vsel %vm1253_vm15, %v1344_v33, 0.0  ;;  %v1346_v38 = vsel %vm1254_vm6, %v1343_v34, 0.0  ;;  %v1337_v39 = vsel %vm1239_vm12, %v1336_v35, 0.0  ;;  %v1338_v40 = vsel %vm1240_vm1, %v1335_v36, 0.0  ;;  %v1519_v62 = vpop.f32.mrf.mxu1 }
 0x7df   :  { %1349 = vrot.lane.b32.xlu2 %v1345_v37, %s2728_s14  ;;  %1351 = vrot.lane.b32.xlu0 %v1346_v38, %s2728_s14  ;;  %1339 = vst.msk [vmem:[#allocation2] sm:$0xff] %vm186_vm11, %v1337_v39  ;;  %v1520_v11 = vadd.f32 %v2715_v4, %v1519_v62  ;;  %vm1528_vm0 = vcmp.ge.s32.totalorder %v3230_v49, 4  ;;  %vm1529_vm6 = vcmp.ge.s32.totalorder %v3232_v2, 4  ;;  %v2687_v49 = vld [vmem:[%s3594_s1 + $0x2d8] sm:$0xff] }
 0x7e0   :  { %1340 = vst.msk [vmem:[#allocation2 + $0x10] sm:$0xff] %vm186_vm11, %v1338_v40 }
 0x7e2   :  { %v1362_v42 = vld [vmem:[#allocation2 + $0x18] sm:$0xff] }
 0x7e3   :  { %v1364_v43 = vpack.c.bf16 %v1362_v42, %v1360_v41  ;;  %v2666_v41 = vld [vmem:[%s3594_s1 + $0x230] sm:$0xff]  ;;  %v2665_v42 = vld [vmem:[%s3594_s1 + $0x228] sm:$0xff] }
 0x7e4   :  { %1667 = vmatpush.bf16.msrb.mxu2 %v2666_v41 }
 0x7e5   :  { %2436 = vmatmul.msk.bf16.vlgmr.msrb.gmra.mxu3 %vm186_vm11, %v1364_v43  ;;  %v2664_v43 = vld [vmem:[%s3594_s1 + $0x220] sm:$0xff] }
 0x7e6   :  { %v1521_v18 = vpop.f32.mrf.mxu1 }
 0x7e7   :  { %v1522_v21 = vadd.f32 %v2715_v4, %v1521_v18  ;;  %v2675_v18 = vld [vmem:[%s3594_s1 + $0x278] sm:$0xff] }
 0x7e8   :  { %1668 = vmatpush.bf16.msrb.mxu2 %v2665_v42 }
 0x7ec   :  { %1669 = vmatpush.bf16.msrb.mxu2 %v2664_v43 }
 0x7f0   :  { %1670 = vmatpush.bf16.msrb.mxu2 %v2663_v44 }
 0x7f4   :  { %1671 = vmatpush.bf16.msrb.mxu2 %v2662_v1 }
 0x7f8   :  { %1672 = vmatpush.bf16.msrb.mxu2 %v2661_v6 }
 0x7fc   :  { %1673 = vmatpush.bf16.msrb.mxu2 %v2660_v45 }
 0x800   :  { %1674 = vmatpush.bf16.msrb.mxu2 %v2659_v46 }
 0x839   :  { %v1350_v7 = vpop.permute.xlu2 %1349 }
 0x83a   :  { %1355 = vst.msk [vmem:[#allocation2] sm:$0xff] %vm219_vm13, %v1350_v7 }
 0x841   :  { %v1359_v50 = vld [vmem:[#allocation2] sm:$0xff] }
 0x851   :  { %v1352_v9 = vpop.permute.xlu0 %1351 }
 0x852   :  { %1356 = vst.msk [vmem:[#allocation2 + $0x10] sm:$0xff] %vm219_vm13, %v1352_v9 }
 0x859   :  { %v1361_v51 = vld [vmem:[#allocation2 + $0x10] sm:$0xff] }
 0x85a   :  { %v1363_v52 = vpack.c.bf16 %v1361_v51, %v1359_v50  ;;  %v2718_v50 = vld [vmem:[%s3593_s2 + $0xe] ss:$0 sm:$0xff] }
 0x85c   :  { %1474 = vmatmul.bf16.vlgmr.msrb.gmra.mxu0 %v1363_v52 }
 0x868   :  { %v1489_v63 = vpop.f32.mrf.mxu3 }
 0x870   :  { %v1491_v19 = vpop.f32.mrf.mxu3 }
 0x8d9   :  { %v1475_v0 = vpop.f32.mrf.mxu0 }
 0x8da   :  { %v1476_v8 = vadd.f32 %v2716_v61, %v1475_v0 }
 0x8dc   :  { %v1490_v10 = vadd.f32 %v1489_v63, %v1476_v8 }
 0x8de   :  { %v1494_v12 = vmax.f32 %v1490_v10, 0.0 }
 0x8e0   :  { %v1524_v13 = vadd.f32 %v1520_v11, %v1494_v12 }
 0x8e1   :  { %v1477_v15 = vpop.f32.mrf.mxu0 }
 0x8e2   :  { %v1526_v16 = vmax.f32 %v1524_v13, 0.0  ;;  %v1478_v17 = vadd.f32 %v2716_v61, %v1477_v15 }
 0x8e4   :  { %1558 = vst.msk [vmem:[#allocation2 + $0x8] sm:$0xff] %vm186_vm11, %v1526_v16  ;;  %v1492_v20 = vadd.f32 %v1491_v19, %v1478_v17  ;;  %v1542_v25 = vrot.slane %v1526_v16, 6  ;;  %v1530_v29 = vrot.slane %v1526_v16, 4  ;;  %v2676_v17 = vld [vmem:[%s3594_s1 + $0x280] sm:$0xff]  ;;  %v2674_v19 = vld [vmem:[%s3594_s1 + $0x270] sm:$0xff] }
 0x8e5   :  { %1789 = vmatpush.bf16.msra.mxu3 %v2676_v17 }
 0x8e6   :  { %v1495_v22 = vmax.f32 %v1492_v20, 0.0  ;;  %v2673_v20 = vld [vmem:[%s3594_s1 + $0x268] sm:$0xff] }
 0x8e8   :  { %v1525_v23 = vadd.f32 %v1522_v21, %v1495_v22  ;;  %v2672_v21 = vld [vmem:[%s3594_s1 + $0x260] sm:$0xff]  ;;  %v2671_v22 = vld [vmem:[%s3594_s1 + $0x258] sm:$0xff] }
 0x8e9   :  { %1790 = vmatpush.bf16.msra.mxu3 %v2675_v18 }
 0x8ea   :  { %v1527_v24 = vmax.f32 %v1525_v23, 0.0 }
 0x8eb   :  { %v1561_v38 = vld [vmem:[#allocation2 + $0x8] sm:$0xff] }
 0x8ec   :  { %1559 = vst.msk [vmem:[#allocation2 + $0x18] sm:$0xff] %vm186_vm11, %v1527_v24  ;;  %v1811_v26 = vpack.c.bf16 %v1527_v24, %v1526_v16  ;;  %v1543_v27 = vrot.slane %v1527_v24, 6  ;;  %v1531_v28 = vrot.slane %v1527_v24, 4 }
 0x8ed   :  { %1791 = vmatpush.bf16.msra.mxu3 %v2674_v19 }
 0x8ee   :  { %2532 = vmatmul.msk.bf16.vlgmr.msra.gmra.mxu1 %vm186_vm11, %v1811_v26  ;;  %v1545_v30 = vsel %vm36_vm3, %v1543_v27, %v1542_v25  ;;  %v1544_v31 = vsel %vm36_vm3, %v1542_v25, %v1543_v27  ;;  %v1532_v32 = vsel %vm436_vm14, %v1530_v29, %v1531_v28  ;;  %v1533_v33 = vsel %vm436_vm14, %v1531_v28, %v1530_v29 }
 0x8ef   :  { %v1546_v34 = vsel %vm1239_vm12, %v1545_v30, 0.0  ;;  %v1547_v35 = vsel %vm1240_vm1, %v1544_v31, 0.0  ;;  %v1539_v36 = vsel %vm1529_vm6, %v1532_v32, 0.0  ;;  %v1538_v37 = vsel %vm1528_vm0, %v1533_v33, 0.0  ;;  %v2691_v30 = vld [vmem:[%s3594_s1 + $0x2f8] sm:$0xff]  ;;  %v2690_v31 = vld [vmem:[%s3594_s1 + $0x2f0] sm:$0xff] }
 0x8f0   :  { %1550 = vrot.lane.b32.xlu1 %v1546_v34, %s2728_s14  ;;  %1552 = vrot.lane.b32.xlu2 %v1547_v35, %s2728_s14  ;;  %1541 = vst.msk [vmem:[#allocation2 + $0x10] sm:$0xff] %vm186_vm11, %v1539_v36  ;;  %v2719_v32 = vld [vmem:[%s3593_s2 + $0xf] ss:$0 sm:$0xff]  ;;  %v2717_v34 = vld [vmem:[%s3593_s2 + $0x10] ss:$0 sm:$0xff] }
 0x8f1   :  { %1540 = vst.msk [vmem:[#allocation2] sm:$0xff] %vm186_vm11, %v1538_v37  ;;  %1792 = vmatpush.bf16.msra.mxu3 %v2673_v20  ;;  %v2689_v20 = vld [vmem:[%s3594_s1 + $0x2e8] sm:$0xff] }
 0x8f2   :  { %2024 = vmatpush.bf16.msrb.mxu0 %v2689_v20 }
 0x8f3   :  { %v1563_v39 = vld [vmem:[#allocation2 + $0x18] sm:$0xff] }
 0x8f4   :  { %v1565_v40 = vpack.c.bf16 %v1563_v39, %v1561_v38 }
 0x8f5   :  { %1793 = vmatpush.bf16.msra.mxu3 %v2672_v21 }
 0x8f6   :  { %2490 = vmatmul.msk.bf16.vlgmr.msra.gmra.mxu0 %vm186_vm11, %v1565_v40 }
 0x8f7   :  { %2025 = vmatpush.bf16.msrb.mxu0 %v2688_v3 }
 0x8f9   :  { %1794 = vmatpush.bf16.msra.mxu3 %v2671_v22 }
 0x8fb   :  { %2026 = vmatpush.bf16.msrb.mxu0 %v2687_v49 }
 0x8fd   :  { %2063 = vmatpush.bf16.msrb.mxu3 %v2691_v30 }
 0x901   :  { %2064 = vmatpush.bf16.msrb.mxu3 %v2690_v31 }
 0x94a   :  { %v1553_v47 = vpop.permute.xlu2 %1552 }
 0x94b   :  { %1557 = vst.msk [vmem:[#allocation2 + $0x10] sm:$0xff] %vm219_vm13, %v1553_v47 }
 0x952   :  { %v1562_v7 = vld [vmem:[#allocation2 + $0x10] sm:$0xff] }
 0x962   :  { %v1551_v48 = vpop.permute.xlu1 %1550 }
 0x963   :  { %1556 = vst.msk [vmem:[#allocation2] sm:$0xff] %vm219_vm13, %v1551_v48 }
 0x96a   :  { %v1560_v14 = vld [vmem:[#allocation2] sm:$0xff] }
 0x96b   :  { %v1564_v9 = vpack.c.bf16 %v1562_v7, %v1560_v14  ;;  %v1850_v33 = vpop.f32.mrf.mxu1 }
 0x96c   :  { %v1851_v37 = vadd.f32 %v2717_v34, %v1850_v33 }
 0x96d   :  { %1675 = vmatmul.bf16.vlgmr.msrb.gmra.mxu2 %v1564_v9 }
 0x973   :  { %v1690_v51 = vpop.f32.mrf.mxu0  ;;  %v1852_v41 = vpop.f32.mrf.mxu1 }
 0x974   :  { %v1853_v44 = vadd.f32 %v2717_v34, %v1852_v41 }
 0x97b   :  { %v1692_v58 = vpop.f32.mrf.mxu0 }
 0x9f0   :  { %v1676_v52 = vpop.f32.mrf.mxu2 }
 0x9f1   :  { %v1677_v53 = vadd.f32 %v2718_v50, %v1676_v52  ;;  %v2685_v52 = vld [vmem:[%s3594_s1 + $0x2c8] sm:$0xff] }
 0x9f3   :  { %v1691_v54 = vadd.f32 %v1690_v51, %v1677_v53  ;;  %v2686_v51 = vld [vmem:[%s3594_s1 + $0x2d0] sm:$0xff]  ;;  %v2684_v53 = vld [vmem:[%s3594_s1 + $0x2c0] sm:$0xff] }
 0x9f4   :  { %1945 = vmatpush.bf16.msra.mxu2 %v2686_v51 }
 0x9f5   :  { %v1695_v55 = vmax.f32 %v1691_v54, 0.0  ;;  %v2683_v54 = vld [vmem:[%s3594_s1 + $0x2b8] sm:$0xff] }
 0x9f7   :  { %1723 = vrot.lane.b32.xlu2 %v1695_v55, %s2728_s14  ;;  %v1697_v61 = vrot.slane %v1695_v55, 4  ;;  %v1705_v63 = vrot.slane %v1695_v55, 6 }
 0x9f8   :  { %v1678_v56 = vpop.f32.mrf.mxu2  ;;  %1946 = vmatpush.bf16.msra.mxu2 %v2685_v52  ;;  %v2695_v52 = vld [vmem:[%s3594_s1 + $0x318] sm:$0xff] }
 0x9f9   :  { %v1679_v57 = vadd.f32 %v2718_v50, %v1678_v56  ;;  %v2682_v56 = vld [vmem:[%s3594_s1 + $0x2b0] sm:$0xff]  ;;  %2158 = vmatpush.bf16.msrb.mxu1 %v2695_v52 }
 0x9fb   :  { %v1693_v59 = vadd.f32 %v1692_v58, %v1679_v57  ;;  %v2681_v57 = vld [vmem:[%s3594_s1 + $0x2a8] sm:$0xff] }
 0x9fc   :  { %1947 = vmatpush.bf16.msra.mxu2 %v2684_v53  ;;  %v2694_v53 = vld [vmem:[%s3594_s1 + $0x310] sm:$0xff] }
 0x9fd   :  { %v1696_v60 = vmax.f32 %v1693_v59, 0.0  ;;  %2159 = vmatpush.bf16.msrb.mxu1 %v2694_v53 }
 0x9ff   :  { %v1698_v62 = vrot.slane %v1696_v60, 4  ;;  %v1706_v0 = vrot.slane %v1696_v60, 6 }
 0xa00   :  { %1948 = vmatpush.bf16.msra.mxu2 %v2683_v54  ;;  %v2693_v54 = vld [vmem:[%s3594_s1 + $0x308] sm:$0xff] }
 0xa01   :  { %v1708_v4 = vsel %vm36_vm3, %v1706_v0, %v1705_v63  ;;  %v1707_v8 = vsel %vm36_vm3, %v1705_v63, %v1706_v0  ;;  %v1700_v10 = vsel %vm436_vm14, %v1698_v62, %v1697_v61  ;;  %v1699_v11 = vsel %vm436_vm14, %v1697_v61, %v1698_v62  ;;  %v2721_v0 = vld [vmem:[%s3593_s2 + $0x11] ss:$0 sm:$0xff]  ;;  %2160 = vmatpush.bf16.msrb.mxu1 %v2693_v54 }
 0xa02   :  { %v1709_v12 = vsel %vm1239_vm12, %v1708_v4, 0.0  ;;  %v1710_v13 = vsel %vm1240_vm1, %v1707_v8, 0.0  ;;  %v1701_v15 = vsel %vm1528_vm0, %v1700_v10, 0.0  ;;  %v1702_v16 = vsel %vm1529_vm6, %v1699_v11, 0.0 }
 0xa03   :  { %1713 = vrot.lane.b32.xlu0 %v1709_v12, %s2729_s10  ;;  %1715 = vrot.lane.b32.xlu1 %v1710_v13, %s2729_s10  ;;  %1703 = vst.msk [vmem:[#allocation2] sm:$0xff] %vm663_vm2, %v1701_v15  ;;  %vm3597_vm3 = vcmask 785408  }
 0xa04   :  { %1704 = vst.msk [vmem:[#allocation2 + $0x10] sm:$0xff] %vm663_vm2, %v1702_v16  ;;  %1949 = vmatpush.bf16.msra.mxu2 %v2682_v56  ;;  %vm3598_vm13 = vmmov %vm3597_vm3 }
 0xa08   :  { %1950 = vmatpush.bf16.msra.mxu2 %v2681_v57 }
 0xa0b   :  { %1725 = vrot.lane.b32.xlu0 %v1696_v60, %s2728_s14 }
 0xa51   :  { %v1724_v25 = vpop.permute.xlu2 %1723 }
 0xa75   :  { %v1714_v23 = vpop.permute.xlu0 %1713  ;;  %v1716_v24 = vpop.permute.xlu1 %1715 }
 0xa76   :  { %1719 = vst.msk [vmem:[#allocation2] sm:$0xff] %vm696_vm4, %v1714_v23 }
 0xa77   :  { %1729 = vst.msk [vmem:[#allocation2] sm:$0xff] %vm717_vm5, %v1724_v25 }
 0xa78   :  { %1720 = vst.msk [vmem:[#allocation2 + $0x10] sm:$0xff] %vm696_vm4, %v1716_v24 }
 0xa7d   :  { %v1726_v26 = vpop.permute.xlu0 %1725 }
 0xa7e   :  { %1730 = vst.msk [vmem:[#allocation2 + $0x10] sm:$0xff] %vm717_vm5, %v1726_v26  ;;  %v1731_v27 = vld [vmem:[#allocation2] sm:$0xff] }
 0xa7f   :  { %1859 = vst.msk [vmem:[#allocation2] sm:$0xff] %vm663_vm2, %v2730_v5 }
 0xa85   :  { %v1732_v28 = vld [vmem:[#allocation2 + $0x10] sm:$0xff] }
 0xa86   :  { %v1733_v29 = vpack.c.bf16 %v1732_v28, %v1731_v27  ;;  %1860 = vst.msk [vmem:[#allocation2 + $0x10] sm:$0xff] %vm663_vm2, %v2730_v5  ;;  %v2722_v27 = vld [vmem:[%s3593_s2 + $0x12] ss:$0 sm:$0xff] }
 0xa88   :  { %2515 = vmatmul.msk.bf16.vlgmr.msra.gmra.mxu3 %vm3597_vm3, %v1733_v29  ;;  %v2720_v29 = vld [vmem:[%s3593_s2 + $0x13] ss:$0 sm:$0xff] }
 0xb0b   :  { %v1796_v35 = vpop.f32.mrf.mxu3 }
 0xb0c   :  { %v1797_v36 = vadd.f32 %v2719_v32, %v1796_v35  ;;  %v2723_v35 = vld [vmem:[%s3593_s2 + $0x14] ss:$0 sm:$0xff] }
 0xb0e   :  { %v1801_v38 = vmax.f32 %v1797_v36, 0.0 }
 0xb10   :  { %v1855_v39 = vadd.f32 %v1851_v37, %v1801_v38  ;;  %v2724_v37 = vld [vmem:[%s3593_s2 + $0x15] ss:$0 sm:$0xff] }
 0xb12   :  { %v1857_v40 = vmax.f32 %v1855_v39, 0.0 }
 0xb13   :  { %v1798_v42 = vpop.f32.mrf.mxu3 }
 0xb14   :  { %v1799_v43 = vadd.f32 %v2719_v32, %v1798_v42  ;;  %1879 = vrot.lane.b32.xlu0 %v1857_v40, %s2728_s14  ;;  %v1861_v47 = vrot.slane %v1857_v40, 4 }
 0xb16   :  { %v1802_v1 = vmax.f32 %v1799_v43, 0.0 }
 0xb18   :  { %v1856_v6 = vadd.f32 %v1853_v44, %v1802_v1 }
 0xb1a   :  { %v1858_v45 = vmax.f32 %v1856_v6, 0.0 }
 0xb1c   :  { %v2039_v46 = vpack.c.bf16 %v1858_v45, %v1857_v40  ;;  %v1862_v48 = vrot.slane %v1858_v45, 4 }
 0xb1e   :  { %2579 = vmatmul.msk.bf16.vlgmr.msrb.gmra.mxu3 %vm663_vm2, %v2039_v46  ;;  %v1864_v14 = vsel %vm436_vm14, %v1862_v48, %v1861_v47  ;;  %v1863_v7 = vsel %vm436_vm14, %v1861_v47, %v1862_v48  ;;  %vm2097_vm2 = vcmask 255104  }
 0xb1f   :  { %v1865_v9 = vsel %vm1528_vm0, %v1864_v14, 0.0  ;;  %v1866_v50 = vsel %vm1529_vm6, %v1863_v7, 0.0 }
 0xb20   :  { %1869 = vrot.lane.b32.xlu1 %v1865_v9, %s2729_s10  ;;  %1871 = vrot.lane.b32.xlu2 %v1866_v50, %s2729_s10 }
 0xb28   :  { %1881 = vrot.lane.b32.xlu1 %v1858_v45, %s2728_s14 }
 0xb7a   :  { %v1872_v55 = vpop.permute.xlu2 %1871 }
 0xb7b   :  { %1876 = vst.msk [vmem:[#allocation2 + $0x10] sm:$0xff] %vm696_vm4, %v1872_v55  ;;  %v2692_v55 = vld [vmem:[%s3594_s1 + $0x300] sm:$0xff] }
 0xb7c   :  { %2161 = vmatpush.bf16.msrb.mxu1 %v2692_v55 }
 0xb86   :  { %v1880_v59 = vpop.permute.xlu0 %1879 }
 0xb92   :  { %v1870_v58 = vpop.permute.xlu1 %1869 }
 0xb93   :  { %1875 = vst.msk [vmem:[#allocation2] sm:$0xff] %vm696_vm4, %v1870_v58  ;;  %vm2105_vm4 = vcmask 386304  }
 0xb94   :  { %1885 = vst.msk [vmem:[#allocation2] sm:$0xff] %vm717_vm5, %v1880_v59 }
 0xb9a   :  { %v1882_v60 = vpop.permute.xlu1 %1881 }
 0xb9b   :  { %1886 = vst.msk [vmem:[#allocation2 + $0x10] sm:$0xff] %vm717_vm5, %v1882_v60  ;;  %v1887_v61 = vld [vmem:[#allocation2] sm:$0xff]  ;;  %vm2113_vm5 = vcmask 517504  }
 0xb9c   :  { %1959 = vst.msk [vmem:[#allocation2] sm:$0xff] %vm1038_vm7, %v2730_v5 }
 0xba1   :  { %v2066_v28 = vpop.f32.mrf.mxu3 }
 0xba2   :  { %v1888_v62 = vld [vmem:[#allocation2 + $0x10] sm:$0xff]  ;;  %v2067_v32 = vadd.f32 %v2720_v29, %v2066_v28 }
 0xba3   :  { %v1889_v63 = vpack.c.bf16 %v1888_v62, %v1887_v61  ;;  %1960 = vst.msk [vmem:[#allocation2 + $0x10] sm:$0xff] %vm1038_vm7, %v2730_v5  ;;  %v2725_v61 = vld [vmem:[%s3593_s2 + $0x16] ss:$0 sm:$0xff] }
 0xba5   :  { %2557 = vmatmul.msk.bf16.vlgmr.msra.gmra.mxu2 %vm3598_vm13, %v1889_v63 }
 0xba9   :  { %v2068_v38 = vpop.f32.mrf.mxu3 }
 0xbaa   :  { %v2069_v42 = vadd.f32 %v2720_v29, %v2068_v38 }
 0xc28   :  { %v1952_v4 = vpop.f32.mrf.mxu2 }
 0xc29   :  { %v1953_v8 = vadd.f32 %v2721_v0, %v1952_v4 }
 0xc2b   :  { %v1957_v10 = vmax.f32 %v1953_v8, 0.0 }
 0xc2d   :  { %1979 = vrot.lane.b32.xlu1 %v1957_v10, %s2729_s10  ;;  %v1961_v15 = vrot.slane %v1957_v10, 4 }
 0xc30   :  { %v1954_v11 = vpop.f32.mrf.mxu2 }
 0xc31   :  { %v1955_v12 = vadd.f32 %v2721_v0, %v1954_v11 }
 0xc33   :  { %v1958_v13 = vmax.f32 %v1955_v12, 0.0 }
 0xc35   :  { %v1962_v16 = vrot.slane %v1958_v13, 4 }
 0xc37   :  { %v1964_v17 = vsel %vm436_vm14, %v1962_v16, %v1961_v15  ;;  %v1963_v5 = vsel %vm436_vm14, %v1961_v15, %v1962_v16  ;;  %vm2090_vm14 = vcmask 123904  }
 0xc38   :  { %v1965_v18 = vsel %vm1528_vm0, %v1964_v17, 0.0  ;;  %v1966_v19 = vsel %vm1529_vm6, %v1963_v5, 0.0 }
 0xc39   :  { %1969 = vrot.lane.b32.xlu2 %v1965_v18, %s2731_s20  ;;  %1971 = vrot.lane.b32.xlu0 %v1966_v19, %s2731_s20 }
 0xc41   :  { %1981 = vrot.lane.b32.xlu2 %v1958_v13, %s2729_s10 }
 0xc93   :  { %v1970_v2 = vpop.permute.xlu2 %1969 }
 0xc94   :  { %1975 = vst.msk [vmem:[#allocation2] sm:$0xff] %vm1071_vm8, %v1970_v2 }
 0xc9b   :  { %v1982_v23 = vpop.permute.xlu2 %1981 }
 0xc9f   :  { %v1980_v21 = vpop.permute.xlu1 %1979 }
 0xca0   :  { %1985 = vst.msk [vmem:[#allocation2] sm:$0xff] %vm1092_vm9, %v1980_v21 }
 0xca7   :  { %v1987_v24 = vld [vmem:[#allocation2] sm:$0xff] }
 0xcab   :  { %v1972_v22 = vpop.permute.xlu0 %1971 }
 0xcac   :  { %1976 = vst.msk [vmem:[#allocation2 + $0x10] sm:$0xff] %vm1071_vm8, %v1972_v22 }
 0xcad   :  { %1986 = vst.msk [vmem:[#allocation2 + $0x10] sm:$0xff] %vm1092_vm9, %v1982_v23 }
 0xcb4   :  { %v1988_v25 = vld [vmem:[#allocation2 + $0x10] sm:$0xff] }
 0xcb5   :  { %v1989_v26 = vpack.c.bf16 %v1988_v25, %v1987_v24 }
 0xcb7   :  { %2570 = vmatmul.msk.bf16.vlgmr.msrb.gmra.mxu0 %vm1129_vm10, %v1989_v26 }
 0xd34   :  { %v2028_v30 = vpop.f32.mrf.mxu0 }
 0xd35   :  { %v2029_v31 = vadd.f32 %v2722_v27, %v2028_v30 }
 0xd37   :  { %v2033_v33 = vmax.f32 %v2029_v31, 0.0 }
 0xd39   :  { %v2071_v34 = vadd.f32 %v2067_v32, %v2033_v33 }
 0xd3b   :  { %v2073_v36 = vmax.f32 %v2071_v34, 0.0 }
 0xd3c   :  { %v2030_v39 = vpop.f32.mrf.mxu0 }
 0xd3d   :  { %v2077_v40 = vmul.f32 %v2723_v35, %v2073_v36  ;;  %v2031_v41 = vadd.f32 %v2722_v27, %v2030_v39 }
 0xd3f   :  { %v2081_v43 = vadd.f32 %v2724_v37, %v2077_v40  ;;  %v2034_v44 = vmax.f32 %v2031_v41, 0.0 }
 0xd41   :  { %2083 = vst.msk [vmem:[#allocation3] sm:$0xff] %vm1038_vm7, %v2081_v43  ;;  %v2072_v1 = vadd.f32 %v2069_v42, %v2034_v44 }
 0xd43   :  { %v2074_v6 = vmax.f32 %v2072_v1, 0.0 }
 0xd45   :  { %v2078_v45 = vmul.f32 %v2723_v35, %v2074_v6 }
 0xd47   :  { %v2082_v46 = vadd.f32 %v2724_v37, %v2078_v45 }
 0xd49   :  { %2084 = vst.msk [vmem:[#allocation3 + $0x8] sm:$0xff] %vm1038_vm7, %v2082_v46 }
 0xd50   :  { %v2085_v47 = vld [vmem:[#allocation3] ss:$2 sm:$0xff]  ;;  %v2086_v48 = vld [vmem:[#allocation3 + $0x1] ss:$2 sm:$0xff] }
 0xd51   :  { %v2087_v14 = vmax.f32 %v2085_v47, %v2086_v48 }
 0xd53   :  { %2088 = vst.msk [vmem:[#allocation3] sm:$0xff] %vm1038_vm7, %v2087_v14  ;;  %vm2167_vm7 = vcmask 156672  }
 0xd5a   :  { %v2108_v7 = vld [vmem:[#allocation3 + $0x3] ss:$4 sm:$0x3]  ;;  %v2100_v9 = vld [vmem:[#allocation3 + $0x2] ss:$4 sm:$0x3] }
 0xd5b   :  { %2110 = vrot.lane.b32.xlu2 %v2108_v7, %s2732_s28  ;;  %2102 = vrot.lane.b32.xlu1 %v2100_v9, %s2729_s10  ;;  %v2092_v50 = vld [vmem:[#allocation3 + $0x1] ss:$4 sm:$0x3]  ;;  %v2089_v51 = vld [vmem:[#allocation3] ss:$4 sm:$0x3] }
 0xd5c   :  { %2094 = vrot.lane.b32.xlu0 %v2092_v50, %s2731_s20  ;;  %2091 = vst.msk [vmem:[#allocation4] sm:$0x3] %vm2090_vm14, %v2089_v51 }
 0xdb5   :  { %v2111_v58 = vpop.permute.xlu2 %2110 }
 0xdcd   :  { %v2103_v56 = vpop.permute.xlu1 %2102 }
 0xdce   :  { %v2095_v57 = vpop.permute.xlu0 %2094 }
 0xdcf   :  { %2098 = vst.msk [vmem:[#allocation4] sm:$0x3] %vm2097_vm2, %v2095_v57 }
 0xdd0   :  { %2106 = vst.msk [vmem:[#allocation4] sm:$0x3] %vm2105_vm4, %v2103_v56 }
 0xdd1   :  { %2114 = vst.msk [vmem:[#allocation4] sm:$0x3] %vm2113_vm5, %v2111_v58 }
 0xdd8   :  { %v2123_v59 = vld [vmem:[#allocation4] sm:$0x3] }
 0xdd9   :  { %v2124_v60 = vpack.c.bf16 %v2123_v59, %v2123_v59 }
 0xddb   :  { %2596 = vmatmul.msk.bf16.vlgmr.msrb.gmra.mxu1 %vm186_vm11, %v2124_v60 }
 0xe58   :  { %v2163_v62 = vpop.f32.mrf.mxu1 }
 0xe59   :  { %v2164_v63 = vadd.f32 %v2725_v61, %v2163_v62 }
 0xe5b   :  { %2168 = vst.msk [vmem:[%s3595_s3] sm:$0x3] %vm2167_vm7, %v2164_v63 }
 0xe60   :  { %v2165_v0 = vpop.f32.mrf.mxu1 }

</bundles_post_ra>
